<compile_context>
chip_gen: v6e
topology: v6e:2x2x1
jax: 0.10.0
libtpu: 0.0.40
codegen_flags: <defaults>
</compile_context>

<pallas_src>
import functools
import numpy as np
import jax
import jax.numpy as jnp
from jax.experimental import pallas as pl
from jax.experimental.pallas import tpu as pltpu


# ----------------------------------------------------------------------------
# __init__-equivalent parameter setup (plain numpy / JAX glue, cached)
# ----------------------------------------------------------------------------
def _dft_matrices(n):
    k = np.arange(n)
    w = np.exp(-2j * np.pi * np.outer(k, k) / n)
    return w.real.astype(np.float32), w.imag.astype(np.float32)


def _make_laplacian(n0, n1):
    lapl = np.zeros((n0, n1), np.float64)
    lapl[0, 0] = 4.0
    lapl[0, 1] = -1.0
    lapl[1, 0] = -1.0
    lapl[0, -1] = -1.0
    lapl[-1, 0] = -1.0
    return np.abs(np.fft.fft2(lapl)).astype(np.float32)


_SETUP_CACHE = {}


def _host_setup(h_np, C):
    """PSF-derived constants; cached so repeated forward calls skip numpy."""
    key = (h_np.shape, int(C), h_np.tobytes())
    if key in _SETUP_CACHE:
        return _SETUP_CACHE[key]

    D0, D1 = h_np.shape
    P0, P1 = D0 // 2, D1 // 2
    N0, N1 = 2 * D0, 2 * D1

    h_pad = np.pad(h_np, ((P0, P0), (P1, P1)))
    H = np.fft.fft2(np.fft.fftshift(h_pad))
    Hr = H.real.astype(np.float32)
    Hi = H.imag.astype(np.float32)
    HtH = (np.abs(H) ** 2).astype(np.float32)
    LtL = _make_laplacian(N0, N1)

    f0r, f0i = _dft_matrices(N0)
    f1r, f1i = _dft_matrices(N1)
    F0c = np.concatenate([f0r, f0i], axis=0).astype(np.float32)     # (2N0, N0)
    G0 = np.block([[f0r, f0i], [-f0i, f0r]]).astype(np.float32)     # (2N0, 2N0)
    eye_c = np.eye(C, dtype=np.float32)
    # [blockdiag(F1r) | blockdiag(F1i)] -> single lane-dense RHS (CN1, 2*CN1)
    F1c_bd = np.concatenate(
        [np.kron(eye_c, f1r), np.kron(eye_c, f1i)], axis=1).astype(np.float32)

    consts = tuple(jnp.asarray(a) for a in (
        np.tile(Hr, (1, C)), np.tile(Hi, (1, C)),
        np.tile(HtH, (1, C)), np.tile(LtL, (1, C)),
        F0c, G0, F1c_bd))
    _SETUP_CACHE[key] = consts
    return consts


# ----------------------------------------------------------------------------
# Main ADMM kernel: one batch element (all channels lane-stacked) per grid
# point; all ADMM iterations run inside the kernel via lax.fori_loop.
# ----------------------------------------------------------------------------
def _admm_kernel(mus_ref, cty_ref, hr_ref, hi_ref, hth_ref, ltl_ref,
                 f0c_ref, g0_ref, f1c_ref, out_ref,
                 *, n_iters, inv_n, n1, d0, d1, p0, p1, crop_rows):
    n0, cn1 = hr_ref.shape           # padded rows, channels*padded cols

    def mm(a, b):
        return jnp.dot(a, b, preferred_element_type=jnp.float32)

    def dft2(x):
        # X = F0 @ x @ F1 per channel; x real, channels stacked along lanes.
        a = mm(f0c_ref[...], x)              # (2N0, CN1): [F0r x ; F0i x]
        p = mm(a, f1c_ref[...])              # (2N0, 2CN1): [a F1r | a F1i]
        pr, pi = p[:, :cn1], p[:, cn1:]
        return pr[:n0] - pi[n0:], pi[:n0] + pr[n0:]

    def idft2_real(yr, yi):
        # real( conj(F0) @ Y @ conj(F1) ) / (N0*N1), per channel.
        z = mm(g0_ref[...], jnp.concatenate([yr, yi], axis=0))   # (2N0, CN1)
        q = mm(z, f1c_ref[...])                                  # (2N0, 2CN1)
        return (q[:n0, :cn1] + q[n0:, cn1:]) * inv_n

    def body(it, carry):
        sk, alpha1k, a2k_1, a2k_2, alpha3k, hskp = carry

        mu1 = mus_ref[0, it]
        mu2 = mus_ref[1, it]
        mu3 = mus_ref[2, it]
        tau = mus_ref[3, it]
        inv_mu1 = 1.0 / mu1
        inv_mu2 = 1.0 / mu2
        inv_mu3 = 1.0 / mu3

        # boundary / crop masks from iota compares (no HBM planes)
        row = jax.lax.broadcasted_iota(jnp.int32, (n0, cn1), 0)
        lane = jax.lax.broadcasted_iota(jnp.int32, (n0, cn1), 1)
        if (n1 & (n1 - 1)) == 0:
            col = jnp.bitwise_and(lane, n1 - 1)   # column within a channel
        else:
            col = lane % n1
        vmask = (row < n0 - 1).astype(jnp.float32)
        hmask = (col < n1 - 1).astype(jnp.float32)
        in_crop = ((row >= p0) & (row < p0 + d0) &
                   (col >= p1) & (col < p1 + d1))

        # ---- u update: soft threshold of TV gradient (soft_2d_gradient2_rgb)
        lsk1 = vmask * (sk - pltpu.roll(sk, shift=n0 - 1, axis=0))
        lsk2 = hmask * (sk - pltpu.roll(sk, shift=cn1 - 1, axis=1))
        v = lsk1 + a2k_1 * inv_mu2
        h = lsk2 + a2k_2 * inv_mu2
        mag = jnp.sqrt(v * v + h * h)
        magt = jnp.maximum(mag - tau, 0.0)
        mmult = magt * pl.reciprocal(magt + tau + 1e-5, approx=True)
        ukp_1 = mmult * v                        # last row stays 0
        ukp_2 = mmult * h                        # last col / channel stays 0

        # ---- v update: vmult = 1/(CtC + mu1)  (select -> no cancellation)
        vmult = jnp.where(in_crop, 1.0 / (1.0 + mu1), inv_mu1)
        vkp = vmult * (alpha1k + mu1 * hskp + cty_ref[0])

        # ---- w update (non-negativity)
        wkp = jnp.maximum(alpha3k * inv_mu3 + sk, 0.0)

        # ---- s update, fused in the frequency domain (2 FFT + 2 IFFT):
        #   A = F(vkp - alpha1k/mu1), B = F(mu3*wkp - alpha3k + mu2*Ltv)
        #   SKP = Smult * (mu1*conj(H)*A + B); skp = iF(SKP); Hskp = iF(H*SKP)
        a = ukp_1 - a2k_1 * inv_mu2              # last row 0
        b = ukp_2 - a2k_2 * inv_mu2              # last col / channel 0
        ltv = ((a - pltpu.roll(a, shift=1, axis=0)) +
               (b - pltpu.roll(b, shift=1, axis=1)))

        hr = hr_ref[...]
        hi = hi_ref[...]
        smult = 1.0 / (mu1 * hth_ref[...] + mu2 * ltl_ref[...] + mu3)

        ar, ai = dft2(vkp - alpha1k * inv_mu1)
        br, bi = dft2(mu3 * wkp - alpha3k + mu2 * ltv)
        sr = smult * (mu1 * (hr * ar + hi * ai) + br)   # conj(H) folded in
        si = smult * (mu1 * (hr * ai - hi * ar) + bi)
        skp = idft2_real(sr, si)
        hskp_new = idft2_real(hr * sr - hi * si, hr * si + hi * sr)

        # ---- dual updates
        alpha1k = alpha1k + mu1 * (hskp_new - vkp)
        lskp1 = vmask * (skp - pltpu.roll(skp, shift=n0 - 1, axis=0))
        lskp2 = hmask * (skp - pltpu.roll(skp, shift=cn1 - 1, axis=1))
        a2k_1 = a2k_1 + mu2 * (lskp1 - ukp_1)
        a2k_2 = a2k_2 + mu2 * (lskp2 - ukp_2)
        alpha3k = alpha3k + mu3 * (skp - wkp)

        return (skp, alpha1k, a2k_1, a2k_2, alpha3k, hskp_new)

    zeros = jnp.zeros((n0, cn1), jnp.float32)
    init = (zeros, zeros, zeros, zeros, zeros, zeros)
    sk_final = jax.lax.fori_loop(0, n_iters, body, init)[0]

    if crop_rows:
        # sublane-aligned static slice (p0 % 8 == 0, d0 % 8 == 0)
        out_ref[0] = sk_final[p0:p0 + d0, :]
    else:
        out_ref[0] = sk_final


# ----------------------------------------------------------------------------
# Wrapper (ADMM_Net.forward)
# ----------------------------------------------------------------------------
def admm_net_forward(y, h, mus):
    """y: (B, C, D0, D1) f32 NCHW; h: (D0, D1) PSF; mus: (4, iterations)."""
    y = jnp.asarray(y, jnp.float32)
    B, C, D0, D1 = y.shape
    P0, P1 = D0 // 2, D1 // 2
    N0, N1 = 2 * D0, 2 * D1
    CN1 = C * N1
    iters = int(mus.shape[1])

    hr_t, hi_t, hth_t, ltl_t, F0c, G0, F1c_bd = _host_setup(
        np.asarray(h, np.float64), C)

    mus = jnp.asarray(mus, jnp.float32)

    # Cty = pad_zeros_torch(y), channels laid out along the lane axis.
    y_pad = jnp.pad(y, ((0, 0), (0, 0), (P0, P0), (P1, P1)))
    cty = jnp.transpose(y_pad, (0, 2, 1, 3)).reshape(B, N0, CN1)

    crop_rows = (P0 % 8 == 0) and (D0 % 8 == 0)
    rows_out = D0 if crop_rows else N0

    kernel = functools.partial(
        _admm_kernel, n_iters=iters, inv_n=float(1.0 / (N0 * N1)),
        n1=N1, d0=D0, d1=D1, p0=P0, p1=P1, crop_rows=crop_rows)

    out = pl.pallas_call(
        kernel,
        out_shape=jax.ShapeDtypeStruct((B, rows_out, CN1), jnp.float32),
        grid=(B,),
        in_specs=[
            pl.BlockSpec(memory_space=pltpu.MemorySpace.SMEM),      # mus
            pl.BlockSpec((1, N0, CN1), lambda b: (b, 0, 0)),        # Cty
            pl.BlockSpec((N0, CN1), lambda b: (0, 0)),              # Re(H)
            pl.BlockSpec((N0, CN1), lambda b: (0, 0)),              # Im(H)
            pl.BlockSpec((N0, CN1), lambda b: (0, 0)),              # HtH
            pl.BlockSpec((N0, CN1), lambda b: (0, 0)),              # LtL
            pl.BlockSpec((2 * N0, N0), lambda b: (0, 0)),           # F0c
            pl.BlockSpec((2 * N0, 2 * N0), lambda b: (0, 0)),       # G0
            pl.BlockSpec((CN1, 2 * CN1), lambda b: (0, 0)),         # [F1r|F1i]
        ],
        out_specs=pl.BlockSpec((1, rows_out, CN1), lambda b: (b, 0, 0)),
        compiler_params=pltpu.CompilerParams(
            dimension_semantics=("parallel",),
            vmem_limit_bytes=64 * 1024 * 1024),
    )(mus, cty, hr_t, hi_t, hth_t, ltl_t, F0c, G0, F1c_bd)

    if not crop_rows:
        out = out[:, P0:P0 + D0, :]

    # crop() lane crop + back to NCHW
    x_out = out.reshape(B, D0, C, N1).transpose(0, 2, 1, 3)[..., P1:P1 + D1]

    # normalize_image: per-batch division by max over (C, H, W) — plain XLA.
    m = jnp.max(x_out, axis=(1, 2, 3), keepdims=True)
    return x_out / m


if __name__ == "__main__":
    B, C, D0, D1 = 2, 4, 16, 16    # batch, channels, PSF/image size
    ITERS = 5

    key = jax.random.PRNGKey(0)
    k_h, k_x = jax.random.split(key)
    h = jax.random.uniform(k_h, (D0, D1), jnp.float32)
    h = h / jnp.sum(h)                                  # deterministic PSF
    x = jax.random.uniform(k_x, (B, C, D0, D1), jnp.float32)

    # initialize_learned_variables (non-learned branch): mu=1e-4, tau=2e-3
    mu1 = np.ones(ITERS, np.float32) * 1e-4
    mu2 = np.ones(ITERS, np.float32) * 1e-4
    mu3 = np.ones(ITERS, np.float32) * 1e-4
    tau = np.ones(ITERS, np.float32) * 2e-3
    mus = jnp.asarray(np.stack([mu1, mu2, mu3, tau]))   # (4, iterations)

    out = admm_net_forward(x, np.asarray(h), mus)
    out = jax.block_until_ready(out)
    assert out.shape == (B, C, D0, D1)
    assert bool(jnp.all(jnp.isfinite(out)))
    print("KERNEL_OK")
</pallas_src>

<mosaic_0001>
module attributes {stable_mosaic.version = 11 : i64} {
  func.func @_admm_kernel(%arg0: i32, %arg1: memref<4x5xf32, #tpu.memory_space<smem>>, %arg2: memref<1x32x128xf32, #tpu.memory_space<vmem>>, %arg3: memref<32x128xf32, #tpu.memory_space<vmem>>, %arg4: memref<32x128xf32, #tpu.memory_space<vmem>>, %arg5: memref<32x128xf32, #tpu.memory_space<vmem>>, %arg6: memref<32x128xf32, #tpu.memory_space<vmem>>, %arg7: memref<64x32xf32, #tpu.memory_space<vmem>>, %arg8: memref<64x64xf32, #tpu.memory_space<vmem>>, %arg9: memref<128x256xf32, #tpu.memory_space<vmem>>, %arg10: memref<1x16x128xf32, #tpu.memory_space<vmem>>) attributes {dimension_semantics = [#tpu.dimension_semantics<parallel>], iteration_bounds = array<i64: 2>, scalar_prefetch = 0 : i64, scratch_operands = 0 : i64, tpu.core_type = #tpu.core_type<tc>, window_params = [{transform_indices = @transform_0, window_bounds = array<i64: 4, 5>}, {transform_indices = @transform_1, window_bounds = array<i64: 1, 32, 128>}, {pipeline_mode = #tpu.pipeline_mode<synchronous>, transform_indices = @transform_2, window_bounds = array<i64: 32, 128>}, {pipeline_mode = #tpu.pipeline_mode<synchronous>, transform_indices = @transform_3, window_bounds = array<i64: 32, 128>}, {pipeline_mode = #tpu.pipeline_mode<synchronous>, transform_indices = @transform_4, window_bounds = array<i64: 32, 128>}, {pipeline_mode = #tpu.pipeline_mode<synchronous>, transform_indices = @transform_5, window_bounds = array<i64: 32, 128>}, {pipeline_mode = #tpu.pipeline_mode<synchronous>, transform_indices = @transform_6, window_bounds = array<i64: 64, 32>}, {pipeline_mode = #tpu.pipeline_mode<synchronous>, transform_indices = @transform_7, window_bounds = array<i64: 64, 64>}, {pipeline_mode = #tpu.pipeline_mode<synchronous>, transform_indices = @transform_8, window_bounds = array<i64: 128, 256>}, {transform_indices = @transform_9, window_bounds = array<i64: 1, 16, 128>}]} {
    %cst = arith.constant 0.000000e+00 : f32
    %0 = vector.broadcast %cst : f32 to vector<32x128xf32>
    %c0_i32 = arith.constant 0 : i32
    %c5_i32 = arith.constant 5 : i32
    %1 = arith.addi %c0_i32, %c5_i32 : i32
    %c1_i32 = arith.constant 1 : i32
    %2:6 = scf.for %arg11 = %c0_i32 to %1 step %c1_i32 iter_args(%arg12 = %0, %arg13 = %0, %arg14 = %0, %arg15 = %0, %arg16 = %0, %arg17 = %0) -> (vector<32x128xf32>, vector<32x128xf32>, vector<32x128xf32>, vector<32x128xf32>, vector<32x128xf32>, vector<32x128xf32>)  : i32 {
      %c0_3 = arith.constant 0 : index
      %7 = arith.index_cast %arg11 : i32 to index
      %8 = memref.load %arg1[%c0_3, %7] : memref<4x5xf32, #tpu.memory_space<smem>>
      %c1 = arith.constant 1 : index
      %9 = arith.index_cast %arg11 : i32 to index
      %10 = memref.load %arg1[%c1, %9] : memref<4x5xf32, #tpu.memory_space<smem>>
      %c2 = arith.constant 2 : index
      %11 = arith.index_cast %arg11 : i32 to index
      %12 = memref.load %arg1[%c2, %11] : memref<4x5xf32, #tpu.memory_space<smem>>
      %c3 = arith.constant 3 : index
      %13 = arith.index_cast %arg11 : i32 to index
      %14 = memref.load %arg1[%c3, %13] : memref<4x5xf32, #tpu.memory_space<smem>>
      %cst_4 = arith.constant 1.000000e+00 : f32
      %15 = arith.divf %cst_4, %8 : f32
      %cst_5 = arith.constant 1.000000e+00 : f32
      %16 = arith.divf %cst_5, %10 : f32
      %cst_6 = arith.constant 1.000000e+00 : f32
      %17 = arith.divf %cst_6, %12 : f32
      %18 = tpu.iota {dimensions = array<i32: 0>} : vector<32x128xi32>
      %19 = tpu.iota {dimensions = array<i32: 1>} : vector<32x128xi32>
      %c31_i32 = arith.constant 31 : i32
      %20 = vector.broadcast %c31_i32 : i32 to vector<32x128xi32>
      %21 = arith.andi %19, %20 : vector<32x128xi32>
      %c31_i32_7 = arith.constant 31 : i32
      %22 = vector.broadcast %c31_i32_7 : i32 to vector<32x128xi32>
      %23 = arith.cmpi slt, %18, %22 : vector<32x128xi32>
      %24 = arith.extui %23 : vector<32x128xi1> to vector<32x128xi32>
      %25 = arith.sitofp %24 : vector<32x128xi32> to vector<32x128xf32>
      %c31_i32_8 = arith.constant 31 : i32
      %26 = vector.broadcast %c31_i32_8 : i32 to vector<32x128xi32>
      %27 = arith.cmpi slt, %21, %26 : vector<32x128xi32>
      %28 = arith.extui %27 : vector<32x128xi1> to vector<32x128xi32>
      %29 = arith.sitofp %28 : vector<32x128xi32> to vector<32x128xf32>
      %c8_i32 = arith.constant 8 : i32
      %30 = vector.broadcast %c8_i32 : i32 to vector<32x128xi32>
      %31 = arith.cmpi sge, %18, %30 : vector<32x128xi32>
      %c24_i32 = arith.constant 24 : i32
      %32 = vector.broadcast %c24_i32 : i32 to vector<32x128xi32>
      %33 = arith.cmpi slt, %18, %32 : vector<32x128xi32>
      %34 = arith.andi %31, %33 : vector<32x128xi1>
      %c8_i32_9 = arith.constant 8 : i32
      %35 = vector.broadcast %c8_i32_9 : i32 to vector<32x128xi32>
      %36 = arith.cmpi sge, %21, %35 : vector<32x128xi32>
      %37 = arith.andi %34, %36 : vector<32x128xi1>
      %c24_i32_10 = arith.constant 24 : i32
      %38 = vector.broadcast %c24_i32_10 : i32 to vector<32x128xi32>
      %39 = arith.cmpi slt, %21, %38 : vector<32x128xi32>
      %40 = arith.andi %37, %39 : vector<32x128xi1>
      %c31_i32_11 = arith.constant 31 : i32
      %41 = tpu.dynamic_rotate %arg12 by %c31_i32_11 dim 0 : vector<32x128xf32>, i32 -> vector<32x128xf32>
      %42 = arith.subf %arg12, %41 : vector<32x128xf32>
      %43 = arith.mulf %25, %42 : vector<32x128xf32>
      %c127_i32 = arith.constant 127 : i32
      %44 = tpu.dynamic_rotate %arg12 by %c127_i32 dim 1 : vector<32x128xf32>, i32 -> vector<32x128xf32>
      %45 = arith.subf %arg12, %44 : vector<32x128xf32>
      %46 = arith.mulf %29, %45 : vector<32x128xf32>
      %47 = vector.broadcast %16 : f32 to vector<32x128xf32>
      %48 = arith.mulf %arg14, %47 : vector<32x128xf32>
      %49 = arith.addf %43, %48 : vector<32x128xf32>
      %50 = vector.broadcast %16 : f32 to vector<32x128xf32>
      %51 = arith.mulf %arg15, %50 : vector<32x128xf32>
      %52 = arith.addf %46, %51 : vector<32x128xf32>
      %53 = arith.mulf %49, %49 : vector<32x128xf32>
      %54 = arith.mulf %52, %52 : vector<32x128xf32>
      %55 = arith.addf %53, %54 : vector<32x128xf32>
      %56 = math.sqrt %55 : vector<32x128xf32>
      %57 = vector.broadcast %14 : f32 to vector<32x128xf32>
      %58 = arith.subf %56, %57 : vector<32x128xf32>
      %cst_12 = arith.constant 0.000000e+00 : f32
      %59 = vector.broadcast %cst_12 : f32 to vector<32x128xf32>
      %60 = arith.maximumf %58, %59 : vector<32x128xf32>
      %61 = vector.broadcast %14 : f32 to vector<32x128xf32>
      %62 = arith.addf %60, %61 : vector<32x128xf32>
      %cst_13 = arith.constant 9.99999974E-6 : f32
      %63 = vector.broadcast %cst_13 : f32 to vector<32x128xf32>
      %64 = arith.addf %62, %63 : vector<32x128xf32>
      %65 = tpu.reciprocal %64 {approx = true} : vector<32x128xf32> -> vector<32x128xf32>
      %66 = arith.mulf %60, %65 : vector<32x128xf32>
      %67 = arith.mulf %66, %49 : vector<32x128xf32>
      %68 = arith.mulf %66, %52 : vector<32x128xf32>
      %cst_14 = arith.constant 1.000000e+00 : f32
      %69 = arith.addf %cst_14, %8 : f32
      %cst_15 = arith.constant 1.000000e+00 : f32
      %70 = arith.divf %cst_15, %69 : f32
      %71 = vector.broadcast %70 : f32 to vector<32x128xf32>
      %72 = vector.broadcast %15 : f32 to vector<32x128xf32>
      %73 = arith.select %40, %71, %72 : vector<32x128xi1>, vector<32x128xf32>
      %74 = vector.broadcast %8 : f32 to vector<32x128xf32>
      %75 = arith.mulf %74, %arg17 : vector<32x128xf32>
      %76 = arith.addf %arg13, %75 : vector<32x128xf32>
      %c0_16 = arith.constant 0 : index
      %c0_17 = arith.constant 0 : index
      %c0_18 = arith.constant 0 : index
      %77 = vector.load %arg2[%c0_16, %c0_17, %c0_18] : memref<1x32x128xf32, #tpu.memory_space<vmem>>, vector<1x32x128xf32>
      %78 = vector.shape_cast %77 : vector<1x32x128xf32> to vector<32x128xf32>
      %79 = arith.addf %76, %78 : vector<32x128xf32>
      %80 = arith.mulf %73, %79 : vector<32x128xf32>
      %81 = vector.broadcast %17 : f32 to vector<32x128xf32>
      %82 = arith.mulf %arg16, %81 : vector<32x128xf32>
      %83 = arith.addf %82, %arg12 : vector<32x128xf32>
      %cst_19 = arith.constant 0.000000e+00 : f32
      %84 = vector.broadcast %cst_19 : f32 to vector<32x128xf32>
      %85 = arith.maximumf %83, %84 : vector<32x128xf32>
      %86 = vector.broadcast %16 : f32 to vector<32x128xf32>
      %87 = arith.mulf %arg14, %86 : vector<32x128xf32>
      %88 = arith.subf %67, %87 : vector<32x128xf32>
      %89 = vector.broadcast %16 : f32 to vector<32x128xf32>
      %90 = arith.mulf %arg15, %89 : vector<32x128xf32>
      %91 = arith.subf %68, %90 : vector<32x128xf32>
      %c1_i32_20 = arith.constant 1 : i32
      %92 = tpu.dynamic_rotate %88 by %c1_i32_20 dim 0 : vector<32x128xf32>, i32 -> vector<32x128xf32>
      %93 = arith.subf %88, %92 : vector<32x128xf32>
      %c1_i32_21 = arith.constant 1 : i32
      %94 = tpu.dynamic_rotate %91 by %c1_i32_21 dim 1 : vector<32x128xf32>, i32 -> vector<32x128xf32>
      %95 = arith.subf %91, %94 : vector<32x128xf32>
      %96 = arith.addf %93, %95 : vector<32x128xf32>
      %c0_22 = arith.constant 0 : index
      %c0_23 = arith.constant 0 : index
      %97 = vector.load %arg3[%c0_22, %c0_23] : memref<32x128xf32, #tpu.memory_space<vmem>>, vector<32x128xf32>
      %c0_24 = arith.constant 0 : index
      %c0_25 = arith.constant 0 : index
      %98 = vector.load %arg4[%c0_24, %c0_25] : memref<32x128xf32, #tpu.memory_space<vmem>>, vector<32x128xf32>
      %c0_26 = arith.constant 0 : index
      %c0_27 = arith.constant 0 : index
      %99 = vector.load %arg5[%c0_26, %c0_27] : memref<32x128xf32, #tpu.memory_space<vmem>>, vector<32x128xf32>
      %100 = vector.broadcast %8 : f32 to vector<32x128xf32>
      %101 = arith.mulf %100, %99 : vector<32x128xf32>
      %c0_28 = arith.constant 0 : index
      %c0_29 = arith.constant 0 : index
      %102 = vector.load %arg6[%c0_28, %c0_29] : memref<32x128xf32, #tpu.memory_space<vmem>>, vector<32x128xf32>
      %103 = vector.broadcast %10 : f32 to vector<32x128xf32>
      %104 = arith.mulf %103, %102 : vector<32x128xf32>
      %105 = arith.addf %101, %104 : vector<32x128xf32>
      %106 = vector.broadcast %12 : f32 to vector<32x128xf32>
      %107 = arith.addf %105, %106 : vector<32x128xf32>
      %cst_30 = arith.constant 1.000000e+00 : f32
      %108 = vector.broadcast %cst_30 : f32 to vector<32x128xf32>
      %109 = arith.divf %108, %107 : vector<32x128xf32>
      %110 = vector.broadcast %15 : f32 to vector<32x128xf32>
      %111 = arith.mulf %arg13, %110 : vector<32x128xf32>
      %112 = arith.subf %80, %111 : vector<32x128xf32>
      %c0_31 = arith.constant 0 : index
      %c0_32 = arith.constant 0 : index
      %113 = vector.load %arg7[%c0_31, %c0_32] : memref<64x32xf32, #tpu.memory_space<vmem>>, vector<64x32xf32>
      %cst_33 = arith.constant dense<0.000000e+00> : vector<64x128xf32>
      %114 = tpu.matmul %113, %112, %cst_33 {dimension_numbers = #tpu.dot_dimension_numbers<[1], [0], [0], [1], [0, 0, 1, 1], [], []>} : vector<64x32xf32>, vector<32x128xf32>, vector<64x128xf32> -> vector<64x128xf32>
      %c0_34 = arith.constant 0 : index
      %c0_35 = arith.constant 0 : index
      %115 = vector.load %arg9[%c0_34, %c0_35] : memref<128x256xf32, #tpu.memory_space<vmem>>, vector<128x256xf32>
      %cst_36 = arith.constant dense<0.000000e+00> : vector<64x256xf32>
      %116 = tpu.matmul %114, %115, %cst_36 {dimension_numbers = #tpu.dot_dimension_numbers<[1], [0], [0], [1], [0, 0, 1, 1], [], []>} : vector<64x128xf32>, vector<128x256xf32>, vector<64x256xf32> -> vector<64x256xf32>
      %117 = vector.extract_strided_slice %116 {offsets = [0, 0], sizes = [64, 128], strides = [1, 1]} : vector<64x256xf32> to vector<64x128xf32>
      %118 = vector.extract_strided_slice %116 {offsets = [0, 128], sizes = [64, 128], strides = [1, 1]} : vector<64x256xf32> to vector<64x128xf32>
      %119 = vector.extract_strided_slice %117 {offsets = [0, 0], sizes = [32, 128], strides = [1, 1]} : vector<64x128xf32> to vector<32x128xf32>
      %120 = vector.extract_strided_slice %118 {offsets = [32, 0], sizes = [32, 128], strides = [1, 1]} : vector<64x128xf32> to vector<32x128xf32>
      %121 = arith.subf %119, %120 : vector<32x128xf32>
      %122 = vector.extract_strided_slice %118 {offsets = [0, 0], sizes = [32, 128], strides = [1, 1]} : vector<64x128xf32> to vector<32x128xf32>
      %123 = vector.extract_strided_slice %117 {offsets = [32, 0], sizes = [32, 128], strides = [1, 1]} : vector<64x128xf32> to vector<32x128xf32>
      %124 = arith.addf %122, %123 : vector<32x128xf32>
      %125 = vector.broadcast %12 : f32 to vector<32x128xf32>
      %126 = arith.mulf %125, %85 : vector<32x128xf32>
      %127 = arith.subf %126, %arg16 : vector<32x128xf32>
      %128 = vector.broadcast %10 : f32 to vector<32x128xf32>
      %129 = arith.mulf %128, %96 : vector<32x128xf32>
      %130 = arith.addf %127, %129 : vector<32x128xf32>
      %c0_37 = arith.constant 0 : index
      %c0_38 = arith.constant 0 : index
      %131 = vector.load %arg7[%c0_37, %c0_38] : memref<64x32xf32, #tpu.memory_space<vmem>>, vector<64x32xf32>
      %cst_39 = arith.constant dense<0.000000e+00> : vector<64x128xf32>
      %132 = tpu.matmul %131, %130, %cst_39 {dimension_numbers = #tpu.dot_dimension_numbers<[1], [0], [0], [1], [0, 0, 1, 1], [], []>} : vector<64x32xf32>, vector<32x128xf32>, vector<64x128xf32> -> vector<64x128xf32>
      %c0_40 = arith.constant 0 : index
      %c0_41 = arith.constant 0 : index
      %133 = vector.load %arg9[%c0_40, %c0_41] : memref<128x256xf32, #tpu.memory_space<vmem>>, vector<128x256xf32>
      %cst_42 = arith.constant dense<0.000000e+00> : vector<64x256xf32>
      %134 = tpu.matmul %132, %133, %cst_42 {dimension_numbers = #tpu.dot_dimension_numbers<[1], [0], [0], [1], [0, 0, 1, 1], [], []>} : vector<64x128xf32>, vector<128x256xf32>, vector<64x256xf32> -> vector<64x256xf32>
      %135 = vector.extract_strided_slice %134 {offsets = [0, 0], sizes = [64, 128], strides = [1, 1]} : vector<64x256xf32> to vector<64x128xf32>
      %136 = vector.extract_strided_slice %134 {offsets = [0, 128], sizes = [64, 128], strides = [1, 1]} : vector<64x256xf32> to vector<64x128xf32>
      %137 = vector.extract_strided_slice %135 {offsets = [0, 0], sizes = [32, 128], strides = [1, 1]} : vector<64x128xf32> to vector<32x128xf32>
      %138 = vector.extract_strided_slice %136 {offsets = [32, 0], sizes = [32, 128], strides = [1, 1]} : vector<64x128xf32> to vector<32x128xf32>
      %139 = arith.subf %137, %138 : vector<32x128xf32>
      %140 = vector.extract_strided_slice %136 {offsets = [0, 0], sizes = [32, 128], strides = [1, 1]} : vector<64x128xf32> to vector<32x128xf32>
      %141 = vector.extract_strided_slice %135 {offsets = [32, 0], sizes = [32, 128], strides = [1, 1]} : vector<64x128xf32> to vector<32x128xf32>
      %142 = arith.addf %140, %141 : vector<32x128xf32>
      %143 = arith.mulf %97, %121 : vector<32x128xf32>
      %144 = arith.mulf %98, %124 : vector<32x128xf32>
      %145 = arith.addf %143, %144 : vector<32x128xf32>
      %146 = vector.broadcast %8 : f32 to vector<32x128xf32>
      %147 = arith.mulf %146, %145 : vector<32x128xf32>
      %148 = arith.addf %147, %139 : vector<32x128xf32>
      %149 = arith.mulf %109, %148 : vector<32x128xf32>
      %150 = arith.mulf %97, %124 : vector<32x128xf32>
      %151 = arith.mulf %98, %121 : vector<32x128xf32>
      %152 = arith.subf %150, %151 : vector<32x128xf32>
      %153 = vector.broadcast %8 : f32 to vector<32x128xf32>
      %154 = arith.mulf %153, %152 : vector<32x128xf32>
      %155 = arith.addf %154, %142 : vector<32x128xf32>
      %156 = arith.mulf %109, %155 : vector<32x128xf32>
      %c0_43 = arith.constant 0 : index
      %c0_44 = arith.constant 0 : index
      %157 = vector.load %arg8[%c0_43, %c0_44] : memref<64x64xf32, #tpu.memory_space<vmem>>, vector<64x64xf32>
      %158 = tpu.concatenate %149, %156 in 0 : vector<32x128xf32>, vector<32x128xf32> -> vector<64x128xf32>
      %cst_45 = arith.constant dense<0.000000e+00> : vector<64x128xf32>
      %159 = tpu.matmul %157, %158, %cst_45 {dimension_numbers = #tpu.dot_dimension_numbers<[1], [0], [0], [1], [0, 0, 1, 1], [], []>} : vector<64x64xf32>, vector<64x128xf32>, vector<64x128xf32> -> vector<64x128xf32>
      %c0_46 = arith.constant 0 : index
      %c0_47 = arith.constant 0 : index
      %160 = vector.load %arg9[%c0_46, %c0_47] : memref<128x256xf32, #tpu.memory_space<vmem>>, vector<128x256xf32>
      %cst_48 = arith.constant dense<0.000000e+00> : vector<64x256xf32>
      %161 = tpu.matmul %159, %160, %cst_48 {dimension_numbers = #tpu.dot_dimension_numbers<[1], [0], [0], [1], [0, 0, 1, 1], [], []>} : vector<64x128xf32>, vector<128x256xf32>, vector<64x256xf32> -> vector<64x256xf32>
      %162 = vector.extract_strided_slice %161 {offsets = [0, 0], sizes = [32, 128], strides = [1, 1]} : vector<64x256xf32> to vector<32x128xf32>
      %163 = vector.extract_strided_slice %161 {offsets = [32, 128], sizes = [32, 128], strides = [1, 1]} : vector<64x256xf32> to vector<32x128xf32>
      %164 = arith.addf %162, %163 : vector<32x128xf32>
      %cst_49 = arith.constant 9.765625E-4 : f32
      %165 = vector.broadcast %cst_49 : f32 to vector<32x128xf32>
      %166 = arith.mulf %164, %165 : vector<32x128xf32>
      %167 = arith.mulf %97, %149 : vector<32x128xf32>
      %168 = arith.mulf %98, %156 : vector<32x128xf32>
      %169 = arith.subf %167, %168 : vector<32x128xf32>
      %170 = arith.mulf %97, %156 : vector<32x128xf32>
      %171 = arith.mulf %98, %149 : vector<32x128xf32>
      %172 = arith.addf %170, %171 : vector<32x128xf32>
      %c0_50 = arith.constant 0 : index
      %c0_51 = arith.constant 0 : index
      %173 = vector.load %arg8[%c0_50, %c0_51] : memref<64x64xf32, #tpu.memory_space<vmem>>, vector<64x64xf32>
      %174 = tpu.concatenate %169, %172 in 0 : vector<32x128xf32>, vector<32x128xf32> -> vector<64x128xf32>
      %cst_52 = arith.constant dense<0.000000e+00> : vector<64x128xf32>
      %175 = tpu.matmul %173, %174, %cst_52 {dimension_numbers = #tpu.dot_dimension_numbers<[1], [0], [0], [1], [0, 0, 1, 1], [], []>} : vector<64x64xf32>, vector<64x128xf32>, vector<64x128xf32> -> vector<64x128xf32>
      %c0_53 = arith.constant 0 : index
      %c0_54 = arith.constant 0 : index
      %176 = vector.load %arg9[%c0_53, %c0_54] : memref<128x256xf32, #tpu.memory_space<vmem>>, vector<128x256xf32>
      %cst_55 = arith.constant dense<0.000000e+00> : vector<64x256xf32>
      %177 = tpu.matmul %175, %176, %cst_55 {dimension_numbers = #tpu.dot_dimension_numbers<[1], [0], [0], [1], [0, 0, 1, 1], [], []>} : vector<64x128xf32>, vector<128x256xf32>, vector<64x256xf32> -> vector<64x256xf32>
      %178 = vector.extract_strided_slice %177 {offsets = [0, 0], sizes = [32, 128], strides = [1, 1]} : vector<64x256xf32> to vector<32x128xf32>
      %179 = vector.extract_strided_slice %177 {offsets = [32, 128], sizes = [32, 128], strides = [1, 1]} : vector<64x256xf32> to vector<32x128xf32>
      %180 = arith.addf %178, %179 : vector<32x128xf32>
      %cst_56 = arith.constant 9.765625E-4 : f32
      %181 = vector.broadcast %cst_56 : f32 to vector<32x128xf32>
      %182 = arith.mulf %180, %181 : vector<32x128xf32>
      %183 = arith.subf %182, %80 : vector<32x128xf32>
      %184 = vector.broadcast %8 : f32 to vector<32x128xf32>
      %185 = arith.mulf %184, %183 : vector<32x128xf32>
      %186 = arith.addf %arg13, %185 : vector<32x128xf32>
      %c31_i32_57 = arith.constant 31 : i32
      %187 = tpu.dynamic_rotate %166 by %c31_i32_57 dim 0 : vector<32x128xf32>, i32 -> vector<32x128xf32>
      %188 = arith.subf %166, %187 : vector<32x128xf32>
      %189 = arith.mulf %25, %188 : vector<32x128xf32>
      %c127_i32_58 = arith.constant 127 : i32
      %190 = tpu.dynamic_rotate %166 by %c127_i32_58 dim 1 : vector<32x128xf32>, i32 -> vector<32x128xf32>
      %191 = arith.subf %166, %190 : vector<32x128xf32>
      %192 = arith.mulf %29, %191 : vector<32x128xf32>
      %193 = arith.subf %189, %67 : vector<32x128xf32>
      %194 = vector.broadcast %10 : f32 to vector<32x128xf32>
      %195 = arith.mulf %194, %193 : vector<32x128xf32>
      %196 = arith.addf %arg14, %195 : vector<32x128xf32>
      %197 = arith.subf %192, %68 : vector<32x128xf32>
      %198 = vector.broadcast %10 : f32 to vector<32x128xf32>
      %199 = arith.mulf %198, %197 : vector<32x128xf32>
      %200 = arith.addf %arg15, %199 : vector<32x128xf32>
      %201 = arith.subf %166, %85 : vector<32x128xf32>
      %202 = vector.broadcast %12 : f32 to vector<32x128xf32>
      %203 = arith.mulf %202, %201 : vector<32x128xf32>
      %204 = arith.addf %arg16, %203 : vector<32x128xf32>
      scf.yield %166, %186, %196, %200, %204, %182 : vector<32x128xf32>, vector<32x128xf32>, vector<32x128xf32>, vector<32x128xf32>, vector<32x128xf32>, vector<32x128xf32>
    }
    %c5_i32_0 = arith.constant 5 : i32
    %3 = vector.extract_strided_slice %2#0 {offsets = [8, 0], sizes = [16, 128], strides = [1, 1]} : vector<32x128xf32> to vector<16x128xf32>
    %c0 = arith.constant 0 : index
    %c0_1 = arith.constant 0 : index
    %c0_2 = arith.constant 0 : index
    %4 = vector.load %arg10[%c0, %c0_1, %c0_2] : memref<1x16x128xf32, #tpu.memory_space<vmem>>, vector<1x16x128xf32>
    %5 = vector.shape_cast %4 : vector<1x16x128xf32> to vector<16x128xf32>
    %6 = vector.shape_cast %3 : vector<16x128xf32> to vector<1x16x128xf32>
    tpu.vector_store %arg10[%c0, %c0_1, %c0_2], %6 {strides = array<i32>} : memref<1x16x128xf32, #tpu.memory_space<vmem>>, vector<1x16x128xf32>,
    return
  }
  func.func @transform_0(%arg0: i32) -> (i32, i32) {
    %c0_i32 = arith.constant 0 : i32
    %c0_i32_0 = arith.constant 0 : i32
    %c0_i32_1 = arith.constant 0 : i32
    return %c0_i32, %c0_i32_0 : i32, i32
  }
  func.func @transform_1(%arg0: i32) -> (i32, i32, i32) {
    %c0_i32 = arith.constant 0 : i32
    %c0_i32_0 = arith.constant 0 : i32
    %c0_i32_1 = arith.constant 0 : i32
    return %arg0, %c0_i32, %c0_i32_0 : i32, i32, i32
  }
  func.func @transform_2(%arg0: i32) -> (i32, i32) {
    %c0_i32 = arith.constant 0 : i32
    %c0_i32_0 = arith.constant 0 : i32
    %c0_i32_1 = arith.constant 0 : i32
    return %c0_i32, %c0_i32_0 : i32, i32
  }
  func.func @transform_3(%arg0: i32) -> (i32, i32) {
    %c0_i32 = arith.constant 0 : i32
    %c0_i32_0 = arith.constant 0 : i32
    %c0_i32_1 = arith.constant 0 : i32
    return %c0_i32, %c0_i32_0 : i32, i32
  }
  func.func @transform_4(%arg0: i32) -> (i32, i32) {
    %c0_i32 = arith.constant 0 : i32
    %c0_i32_0 = arith.constant 0 : i32
    %c0_i32_1 = arith.constant 0 : i32
    return %c0_i32, %c0_i32_0 : i32, i32
  }
  func.func @transform_5(%arg0: i32) -> (i32, i32) {
    %c0_i32 = arith.constant 0 : i32
    %c0_i32_0 = arith.constant 0 : i32
    %c0_i32_1 = arith.constant 0 : i32
    return %c0_i32, %c0_i32_0 : i32, i32
  }
  func.func @transform_6(%arg0: i32) -> (i32, i32) {
    %c0_i32 = arith.constant 0 : i32
    %c0_i32_0 = arith.constant 0 : i32
    %c0_i32_1 = arith.constant 0 : i32
    return %c0_i32, %c0_i32_0 : i32, i32
  }
  func.func @transform_7(%arg0: i32) -> (i32, i32) {
    %c0_i32 = arith.constant 0 : i32
    %c0_i32_0 = arith.constant 0 : i32
    %c0_i32_1 = arith.constant 0 : i32
    return %c0_i32, %c0_i32_0 : i32, i32
  }
  func.func @transform_8(%arg0: i32) -> (i32, i32) {
    %c0_i32 = arith.constant 0 : i32
    %c0_i32_0 = arith.constant 0 : i32
    %c0_i32_1 = arith.constant 0 : i32
    return %c0_i32, %c0_i32_0 : i32, i32
  }
  func.func @transform_9(%arg0: i32) -> (i32, i32, i32) {
    %c0_i32 = arith.constant 0 : i32
    %c0_i32_0 = arith.constant 0 : i32
    %c0_i32_1 = arith.constant 0 : i32
    return %arg0, %c0_i32, %c0_i32_0 : i32, i32, i32
  }
}

</mosaic_0001>

<bundles_post_ra>
// kernel: tpu_custom_call.1
= control target key start
LH: loop header
LB: loop body
LE: loop exit
PB: predicated region body
PF: predicated region fallthrough
CT: control target
= control target key end

     0   :  { %s4509_s0 = inlined_call_operand.hbm [shape: f32[4,5], index: 0, kind: input, shape index: {}]   ;;  %s4510_s1 = inlined_call_operand.vmem [shape: f32[2,32,128], index: 1, kind: input, shape index: {}]   ;;  %s4511_s2 = inlined_call_operand.vmem [shape: f32[32,128], index: 2, kind: input, shape index: {}]   ;;  %s4512_s3 = inlined_call_operand.hbm [shape: f32[32,128], index: 3, kind: input, shape index: {}]   ;;  %s4513_s4 = inlined_call_operand.hbm [shape: f32[32,128], index: 4, kind: input, shape index: {}]   ;;  %s4514_s5 = inlined_call_operand.hbm [shape: f32[32,128], index: 5, kind: input, shape index: {}]   ;;  %s4515_s6 = inlined_call_operand.vmem [shape: f32[64,32], index: 6, kind: input, shape index: {}]   ;;  %s4516_s7 = inlined_call_operand.hbm [shape: f32[64,64], index: 7, kind: input, shape index: {}]   ;;  %s4517_s8 = inlined_call_operand.hbm [shape: f32[128,256], index: 8, kind: input, shape index: {}]   ;;  %s4518_s9 = inlined_call_operand.hbm [shape: f32[2,16,128], index: 9, kind: output, shape index: {}]  }
   0x1   :  { %4618 = sst [smem:[#allocation81_spill]] %s4509_s0 }
   0x2   :  { %4619 = sst [smem:[#allocation82_spill]] %s4513_s4 }
   0x3   :  { %14 = vsyncpa [#allocation5], 0 }
   0x4   :  { %15 = vsyncpa [#allocation3], 0 }
   0x5   :  { %16 = vsyncpa [#allocation8], 0 }
   0x6   :  { %17 = vsyncpa [#allocation11], 0 }
   0x7   :  { %18 = vsyncpa [#allocation4], 0 }
   0x8   :  { %20 = vsyncpa [#allocation4 + $0x1], 0  ;;  %s3260_s30 = smov 0   ;;  %s3262_s10 = smov 0  }
   0x9   :  { %s3264_s11 = smov 0   ;;  %s3266_s12 = smov 0  }
   0xa LB: > { %4620 = sst [smem:[#allocation19_spill]] %s3088_s11  ;;  %s3281_s13 = sadd.s32 4294967295, %s3092_s12   ;;  %s3092_s12 = sphi %s3266_s12, %s4787_s12   ;;  %s3088_s11 = sphi %s3264_s11, %s4789_s11   ;;  %s3084_s10 = sphi %s3262_s10, %s4791_s10   ;;  %s3080_s30 = sphi %s3260_s30, %s4790_s30  }
   0xb   : > { %s2142_s14 = sadd.s32 4294967294, %s3092_s12   ;;  %s3285_s15 = sadd.s32 1, %s3092_s12  }
   0xc   : > { %4621 = sst [smem:[#allocation20_spill]] %s3285_s15  ;;  %s227_s16 = sadd.s32 1, %s3088_s11 }
   0xd   : > { %s224_s17 = ssub.s32 %s3092_s12, %s3285_s15  ;;  %p237_p0 = scmp.ne.s32.totalorder %s3088_s11, %s3084_s10 }
   0xe   : > { %p225_p1 = scmp.eq.s32.totalorder %s224_s17, 0  ;;  %p238_p2 = scmp.eq.s32.totalorder %s3281_s13, 1 }
   0xf   : > { %p243_p3 = scmp.ne.s32.totalorder %s3084_s10, %s3080_s30  ;;  %p244_p4 = scmp.eq.s32.totalorder %s2142_s14, 1 }
  0x10   : > { %s3296_s18 = scalar_select %p225_p1, %s3088_s11, %s227_s16  }
  0x11   : > { %p3298_p5 = por %p238_p2, %p237_p0  ;;  %p3302_p6 = por %p244_p4, %p243_p3 }
  0x12   : > { %4622 = sst [smem:[#allocation21_spill]] %s3296_s18  ;;  %p2143_p7 = scmp.ge.s32.totalorder %s3092_s12, 1 }
  0x13   : > { %p251_p8 = scmp.lt.s32.totalorder %s3092_s12, 3  ;;  %p4522_p9 = scmp.eq.s32.totalorder %s3281_s13, 0 }
  0x14   : > { %s3194_s22 = smov [#allocation7]   ;;  %s3195_s25 = smov [#allocation10]  }
  0x15   : > { %p3309_p10 = pnand %p2143_p7, %p251_p8  ;;  %s288_s23 = sshll.u32 %s3194_s22, 4  ;;  %s289_s23 = int_to_ptr.vmem [resolvable:$true] %s288_s23 }
  0x16   : > { %s317_s26 = sshll.u32 %s3195_s25, 4  ;;  %s2786_s28 = scalar_lea.vmem %s289_s23, 512  ;;  %s318_s26 = int_to_ptr.vmem [resolvable:$true] %s317_s26 }
  0x17   : > { %p2429_p11 = pneg %p3309_p10  ;;  %p2787_p0 = scmp.ne.s32.totalorder %s289_s23, %s2786_s28 }
  0x18   : > { %p2794_p3 = scmp.lt.s32.totalorder %s289_s23, %s289_s23  ;;  %p2795_p4 = scmp.lt.s32.totalorder %s2786_s28, %s2786_s28 }
  0x19   : > { %p3317_p12 = pnand %p4522_p9, %p2429_p11 }
  0x1a   : > { %p2796_p7 = por %p2795_p4, %p2794_p3 }
  0x1b   : > { %p3323_p13 = pneg %p3317_p12 }
  0x1d   : > { %p2789_p1 = pnand %p2787_p0, %p3323_p13 }
  0x1f   : > { %p2790_p2 = pneg %p2789_p1 }
  0x21   : > { %p2797_p8 = pnand %p2796_p7, %p2790_p2 }
  0x23   : > { %2800 = shalt.err (!%p2797_p8)
}
  0x24   : > { %s3196_s29 = smov 128   ;;  %s3197_s14 = smov 8  }
  0x25   : > { %s4628_s4 = sld [smem:[#allocation82_spill]]  ;;  %s2812_s22 = scalar_lea.vmem %s318_s26, 1024 }
  0x26   : > { %p2813_p11 = scmp.ne.s32.totalorder %s318_s26, %s2812_s22  ;;  %p2820_p3 = scmp.lt.s32.totalorder %s318_s26, %s318_s26 }
  0x27   : > { %p2821_p2 = scmp.lt.s32.totalorder %s2812_s22, %s2812_s22 }
  0x28   : > { %p2815_p0 = pnand %p2813_p11, %p3323_p13 }
  0x29   : > { %p2822_p4 = por %p2821_p2, %p2820_p3 }
  0x2a   : > { %p2816_p1 = pneg %p2815_p0 }
  0x2b   : > { %2438 = dma.hbm_to_vmem [thread:$0]  (!%p3317_p12), %s4628_s4, 512, %s289_s23, [#allocation8], %s3196_s29, %s3196_s29, %s3197_s14  }
  0x2c   : > { %p2823_p7 = pnand %p2822_p4, %p2816_p1 }
  0x2e   : > { %2826 = shalt.err (!%p2823_p7)
}
  0x2f   : > { %2444 = dma.hbm_to_vmem [thread:$0]  (!%p3317_p12), %s4516_s7, 1024, %s318_s26, [#allocation11], %s3196_s29, %s3196_s29, %s3197_s14  }
  0x30   : > { %s3198_s23 = smov [#allocation2]   ;;  %s4629_s0 = sld [smem:[#allocation81_spill]] }
  0x31   : > { %s3199_s22 = smov [#allocation6]   ;;  %s3200_s18 = smov [#allocation9]  }
  0x32   : > { %s275_s4 = sshll.u32 %s3199_s22, 4  ;;  %s301_s11 = sshll.u32 %s3200_s18, 4  ;;  %s276_s4 = int_to_ptr.vmem [resolvable:$true] %s275_s4  ;;  %s302_s11 = int_to_ptr.vmem [resolvable:$true] %s301_s11 }
  0x33   : > { %s2849_s15 = scalar_lea.vmem %s276_s4, 512  ;;  %p2857_p1 = scmp.lt.s32.totalorder %s276_s4, %s276_s4 }
  0x34   : > { %p2850_p8 = scmp.ne.s32.totalorder %s276_s4, %s2849_s15  ;;  %p2858_p3 = scmp.lt.s32.totalorder %s2849_s15, %s2849_s15 }
  0x36   : > { %2432 = dma.hbm_to_smem (!%p3317_p12), %s4629_s0, 64, %s3198_s23, [#allocation5]  }
  0x37   : > { %p2852_p11 = pnand %p2850_p8, %p3323_p13  ;;  %p2859_p2 = por %p2858_p3, %p2857_p1 }
  0x39   : > { %p2853_p0 = pneg %p2852_p11 }
  0x3b   : > { %p2860_p4 = pnand %p2859_p2, %p2853_p0 }
  0x3d   : > { %2863 = shalt.err (!%p2860_p4)
}
  0x3e   : > { %2435 = dma.hbm_to_vmem [thread:$0]  (!%p3317_p12), %s4512_s3, 512, %s276_s4, [#allocation3], %s3196_s29, %s3196_s29, %s3197_s14  }
  0x3f   : > { %s2875_s18 = scalar_lea.vmem %s302_s11, 512  ;;  %p2883_p9 = scmp.lt.s32.totalorder %s302_s11, %s302_s11 }
  0x40   : > { %p2876_p7 = scmp.ne.s32.totalorder %s302_s11, %s2875_s18  ;;  %p2884_p1 = scmp.lt.s32.totalorder %s2875_s18, %s2875_s18 }
  0x42   : > { %p2878_p8 = pnand %p2876_p7, %p3323_p13  ;;  %p2885_p0 = por %p2884_p1, %p2883_p9 }
  0x44   : > { %p2879_p11 = pneg %p2878_p8 }
  0x46   : > { %p2886_p3 = pnand %p2885_p0, %p2879_p11 }
  0x48   : > { %2889 = shalt.err (!%p2886_p3)
}
  0x49   : > { %2441 = dma.hbm_to_vmem [thread:$0]  (!%p3317_p12), %s4514_s5, 512, %s302_s11, [#allocation8], %s3196_s29, %s3196_s29, %s3197_s14  }
  0x4a   : > { %s3201_s4 = smov [#allocation12]  }
  0x4b   : > { %s330_s23 = sshll.u32 %s3201_s4, 4  ;;  %s331_s23 = int_to_ptr.vmem [resolvable:$true] %s330_s23 }
  0x4c   : > { %s2901_s16 = scalar_lea.vmem %s331_s23, 4096  ;;  %p2909_p7 = scmp.lt.s32.totalorder %s331_s23, %s331_s23 }
  0x4d   : > { %p2902_p2 = scmp.ne.s32.totalorder %s331_s23, %s2901_s16  ;;  %p2910_p8 = scmp.lt.s32.totalorder %s2901_s16, %s2901_s16 }
  0x4f   : > { %p2904_p4 = pnand %p2902_p2, %p3323_p13  ;;  %p2911_p11 = por %p2910_p8, %p2909_p7 }
  0x51   : > { %p2905_p9 = pneg %p2904_p4 }
  0x53   : > { %p2912_p1 = pnand %p2911_p11, %p2905_p9 }
  0x55   : > { %2915 = shalt.err (!%p2912_p1)
}
  0x56   : > { %s3202_s17 = smov 256   ;;  %s3203_s22 = smov 16  }
  0x57   : > { %2447 = dma.hbm_to_vmem [thread:$0]  (!%p3317_p12), %s4517_s8, 4096, %s331_s23, [#allocation11], %s3202_s17, %s3202_s17, %s3203_s22  }
  0x58   : > { %354 = sbr.rel (%p3309_p10) target bundleno = 1415 (0x587), region = 56  ;;  %p4630_p0 = scmp.eq.s32.totalorder (!%p3309_p10), %s3281_s13, 0 }
  0x5d   : > { %3059 = dma.done.wait (%p4630_p0), [#allocation5], 64   ;;  %p4631_p13 = pmov %p4630_p0 }
  0x5e   : > { %p4632_p3 = pmov %p4630_p0 }
  0x5f   : > { %3061 = vsyncadd (%p4631_p13), [#allocation5], 4294967232 }
  0x60   : > { %3063 = dma.done.wait (%p4632_p3), [#allocation3], 512   ;;  %p4633_p2 = pmov %p4630_p0 }
  0x61   : > { %p4634_p4 = pmov %p4630_p0 }
  0x62   : > { %3065 = vsyncadd (%p4633_p2), [#allocation3], 4294966784 }
  0x63   : > { %3067 = dma.done.wait (%p4634_p4), [#allocation8], 1024   ;;  %p4635_p12 = pmov %p4630_p0 }
  0x64   : > { %p4636_p10 = pmov %p4630_p0 }
  0x65   : > { %3069 = vsyncadd (%p4635_p12), [#allocation8], 4294966272 }
  0x66   : > { %3071 = dma.done.wait (%p4636_p10), [#allocation11], 5120   ;;  %p4637_p9 = pmov %p4630_p0 }
  0x68   : > { %3073 = vsyncadd (%p4637_p9), [#allocation11], 4294962176 }
  0x69   : > { %380 = sfence }
  0x6a   : > { %s4523_s11 = sand.u32 1, %s3084_s10   ;;  %p411_p7 = scmp.lt.s32.totalorder %s3281_s13, 1  ;;  %v3409_v0 = vmov 0.0   ;;  %v3411_v1 = vmov 0.0   ;;  %v3413_v2 = vmov 0.0   ;;  %v3415_v3 = vmov 0.0  }
  0x6b   : > { %s2158_s21 = sshll.u32 %s4523_s11, 4  ;;  %v3417_v4 = vmov 0.0   ;;  %v3419_v5 = vmov 0.0   ;;  %v3421_v6 = vmov 0.0   ;;  %v3423_v7 = vmov 0.0   ;;  %s3457_s28 = smov 0  }
  0x6c   : > { %s412_s24 = scalar_select %p411_p7, %s3281_s13, 1  ;;  %v3425_v8 = vmov 0.0   ;;  %v3427_v9 = vmov 0.0   ;;  %v3429_v10 = vmov 0.0   ;;  %v3431_v11 = vmov 0.0  }
  0x6d   : > { %s3407_s15 = scalar_lea.vmem [#allocation13], %s2158_s21  ;;  %v3433_v12 = vmov 0.0   ;;  %v3435_v13 = vmov 0.0   ;;  %v3437_v14 = vmov 0.0   ;;  %v3439_v15 = vmov 0.0  }
  0x6e   : > { %s2203_s27 = sshll.u32 %s412_s24, 5  ;;  %v3441_v16 = vmov 0.0   ;;  %v3443_v17 = vmov 0.0   ;;  %v3445_v18 = vmov 0.0   ;;  %v3447_v19 = vmov 0.0  }
  0x6f   : > { %s3405_s18 = scalar_lea.vmem %s4510_s1, %s2203_s27  ;;  %v3449_v20 = vmov 0.0   ;;  %v3451_v21 = vmov 0.0   ;;  %v3453_v22 = vmov 0.0   ;;  %v3455_v23 = vmov 0.0  }
  0x70 LB: >> { %4638 = vst [vmem:[#allocation22_spill] sm:$0xff] %v3112_v4  ;;  %4639 = vst [vmem:[#allocation23_spill] sm:$0xff] %v3116_v5  ;;  %s3204_s4 = smov 127   ;;  %s446_s23 = sld [smem:[#allocation2 + %s3192_s28]]  ;;  %v4524_v26 = vmov 0.0   ;;  %v3560_v33 = vld [vmem:[%s4515_s6] sm:$0xff]  ;;  %v472_v35 = vlaneseq  ;;  %s3192_s28 = sphi %s3457_s28, %s421_s28   ;;  %v3188_v23 = vphi %v3455_v23, %v4273_v23   ;;  %v3184_v22 = vphi %v3453_v22, %v4785_v22   ;;  %v3180_v21 = vphi %v3451_v21, %v4784_v21   ;;  %v3176_v20 = vphi %v3449_v20, %v4783_v20   ;;  %v3172_v19 = vphi %v3447_v19, %v4349_v19   ;;  %v3168_v18 = vphi %v3445_v18, %v1854_v18   ;;  %v3164_v17 = vphi %v3443_v17, %v1855_v17   ;;  %v3160_v16 = vphi %v3441_v16, %v1856_v16   ;;  %v3156_v15 = vphi %v3439_v15, %v4328_v15   ;;  %v3152_v14 = vphi %v3437_v14, %v4344_v14   ;;  %v3148_v13 = vphi %v3435_v13, %v1899_v13   ;;  %v3144_v12 = vphi %v3433_v12, %v1900_v12   ;;  %v3140_v11 = vphi %v3431_v11, %v1909_v11   ;;  %v3136_v10 = vphi %v3429_v10, %v1910_v10   ;;  %v3132_v9 = vphi %v3427_v9, %v4782_v9   ;;  %v3128_v8 = vphi %v3425_v8, %v1912_v8   ;;  %v3124_v7 = vphi %v3423_v7, %v4285_v7   ;;  %v3120_v6 = vphi %v3421_v6, %v4300_v6   ;;  %v3116_v5 = vphi %v3419_v5, %v4317_v5   ;;  %v3112_v4 = vphi %v3417_v4, %v4781_v4   ;;  %v3108_v3 = vphi %v3415_v3, %v4323_v3   ;;  %v3104_v2 = vphi %v3413_v2, %v1842_v2   ;;  %v3100_v1 = vphi %v3411_v1, %v1843_v1   ;;  %v3096_v0 = vphi %v3409_v0, %v1844_v0  }
  0x71   : >> { %4640 = vst [vmem:[#allocation24_spill] sm:$0xff] %v3120_v6  ;;  %4641 = vst [vmem:[#allocation25_spill] sm:$0xff] %v3124_v7  ;;  %536 = vrot.lane.b32.xlu1 %v3184_v22, %s3204_s4  ;;  %540 = vrot.lane.b32.xlu0 %v3176_v20, %s3204_s4  ;;  %s447_s16 = sshra.s32 %s3192_s28, 7  ;;  %s452_s22 = sand.u32 127, %s3192_s28  ;;  %vm779_vm0 = vcmask 261120   ;;  %v662_v37 = vld [vmem:[%s3405_s18 + $0x18] sm:$0xff] }
  0x72   : >> { %4642 = vst [vmem:[#allocation26_spill] sm:$0xff] %v3128_v8  ;;  %4643 = vst [vmem:[#allocation27_spill] sm:$0xff] %v3132_v9  ;;  %s2204_s17 = sshll.u32 %s447_s16, 7  ;;  %1005 = vmatprep.mubr.f32.mxu1 %v4524_v26  ;;  %2275 = vmatprep.mubr.msk.f32.mxu0 %vm779_vm0, %v3560_v33  ;;  %v478_v38 = vand.u32 127, %v472_v35  ;;  %v660_v51 = vld [vmem:[%s3405_s18 + $0x8] sm:$0xff]  ;;  %v661_v52 = vld [vmem:[%s3405_s18 + $0x10] sm:$0xff] }
  0x73   : >> { %4644 = vst [vmem:[#allocation28_spill] sm:$0xff] %v3136_v10  ;;  %4645 = vst [vmem:[#allocation29_spill] sm:$0xff] %v3140_v11  ;;  %s2205_s26 = sadd.s32 128, %s2204_s17  ;;  %s2207_s25 = sadd.s32 256, %s2204_s17  ;;  %v659_v53 = vld [vmem:[%s3405_s18] sm:$0xff] }
  0x74   : >> { %4646 = vst [vmem:[#allocation30_spill] sm:$0xff] %v3144_v12  ;;  %4647 = vst [vmem:[#allocation31_spill] sm:$0xff] %v3148_v13  ;;  %s453_s21 = sadd.s32 %s2205_s26, %s452_s22  ;;  %s457_s24 = sadd.s32 %s2207_s25, %s452_s22  ;;  %v3572_v42 = vand.u32 31, %v478_v38 }
  0x75   : >> { %4648 = vst [vmem:[#allocation32_spill] sm:$0xff] %v3152_v14  ;;  %4649 = vst [vmem:[#allocation33_spill] sm:$0xff] %v3156_v15  ;;  %534 = vrot.lane.b32.xlu1 %v3188_v23, %s3204_s4  ;;  %538 = vrot.lane.b32.xlu0 %v3180_v21, %s3204_s4  ;;  %s454_s27 = sld [smem:[#allocation2 + %s453_s21]]  ;;  %s2209_s29 = sadd.s32 384, %s2204_s17 }
  0x76   : >> { %4650 = vst [vmem:[#allocation34_spill] sm:$0xff] %v3160_v16  ;;  %4651 = vst [vmem:[#allocation35_spill] sm:$0xff] %v3164_v17  ;;  %s458_s14 = sld [smem:[#allocation2 + %s457_s24]]  ;;  %s3545_s11 = sadd.s32 %s2209_s29, %s452_s22  ;;  %v3547_v24 = vstv %s446_s23  ;;  %vm507_vm1 = vcmp.ge.s32.totalorder %v3572_v42, 8  ;;  %vm512_vm2 = vcmp.lt.s32.totalorder %v3572_v42, 24  ;;  %vm492_vm6 = vcmp.lt.s32.totalorder %v3572_v42, 31 }
  0x77   : >> { %4652 = vst [vmem:[#allocation36_spill] sm:$0xff] %v3168_v18  ;;  %4653 = vst [vmem:[#allocation37_spill] sm:$0xff] %v3172_v19  ;;  %s640_s0 = sadd.f32 1.0, %s446_s23  ;;  %2712 = vrcp.f32 %v3547_v24  ;;  %v654_v34 = vmul.f32 %v3096_v0, %v3547_v24  ;;  %v652_v40 = vmul.f32 %v3104_v2, %v3547_v24  ;;  %v653_v41 = vmul.f32 %v3100_v1, %v3547_v24  ;;  %s421_s28 = sadd.s32 1, %s3192_s28  }
  0x78   : >> { %4654 = vst [vmem:[#allocation38_spill] sm:$0xff] %v3547_v24  ;;  %v651_v43 = vmul.f32 %v3108_v3, %v3547_v24  ;;  %vm514_vm3 = vmand %vm507_vm1, %vm512_vm2  ;;  %v3886_v24 = vld [vmem:[#allocation12 + $0x10] sm:$0xff]  ;;  %p4387_p8 = scmp.ge.s32.totalorder %s421_s28, 5  }
  0x79   : >> { %v641_v25 = vstv %s640_s0  ;;  %v658_v36 = vadd.f32 %v3160_v16, %v654_v34  ;;  %v656_v47 = vadd.f32 %v3168_v18, %v652_v40  ;;  %v657_v48 = vadd.f32 %v3164_v17, %v653_v41  ;;  %v3637_v34 = vld [vmem:[%s4515_s6 + $0x28] sm:$0xff]  ;;  %4686 = vst [vmem:[#allocation70_spill] sm:$0xff] %v3886_v24  ;;  %s2210_s21 = sshll.u32 (%p4387_p8), %s3281_s13, 8  ;;  %s4786_s28 = sand.u32 (%p4387_p8), 1, %s3084_s10  }
  0x7a   : >> { %2714 = vrcp.f32 %v641_v25  ;;  %v655_v50 = vadd.f32 %v3172_v19, %v651_v43  ;;  %v3607_v25 = vld [vmem:[%s4515_s6 + $0x8] sm:$0xff]  ;;  %v518_v40 = vrot.slane %v3184_v22, 1  ;;  %v519_v43 = vrot.slane %v3180_v21, 1  ;;  %s4469_s18 = scalar_lea.sflag (%p4387_p8), [#allocation4], %s4786_s28  ;;  %s3207_s13 = smov (%p4387_p8), [#allocation13]  }
  0x7b   : >> { %v3551_v27 = vstv %s454_s27  ;;  %v666_v39 = vadd.f32 %v662_v37, %v658_v36  ;;  %v664_v55 = vadd.f32 %v660_v51, %v656_v47  ;;  %v665_v56 = vadd.f32 %v661_v52, %v657_v48  ;;  %s2920_s29 = sshll.u32 (%p4387_p8), %s3207_s13, 4  ;;  %s2921_s29 = int_to_ptr.vmem [resolvable:$false] %s2920_s29 }
  0x7c   : >> { %4655 = vst [vmem:[#allocation39_spill] sm:$0xff] %v3551_v27  ;;  %2716 = vrcp.f32 %v3551_v27  ;;  %v3554_v28 = vstv %s458_s14  ;;  %v663_v57 = vadd.f32 %v659_v53, %v655_v50  ;;  %v520_v36 = vrot.slane %v3176_v20, 1  ;;  %s2922_s14 = scalar_lea.vmem (%p4387_p8), %s2921_s29, 512 }
  0x7d   : >> { %4656 = vst [vmem:[#allocation40_spill] sm:$0xff] %v3554_v28  ;;  %2718 = vrcp.f32 %v3554_v28  ;;  %v517_v37 = vrot.slane %v3188_v23, 1 }
  0x84   : >> { %v2713_v29 = vpop.eup %2712 }
  0x85   : >> { %2395 = vpush %v2713_v29  ;;  %v3612_v29 = vld [vmem:[%s4515_s6 + $0x10] sm:$0xff] }
  0x87   : >> { %v2715_v30 = vpop.eup %2714 }
  0x89   : >> { %v2717_v31 = vpop.eup %2716 }
  0x8a   : >> { %v2719_v32 = vpop.eup %2718  ;;  %2397 = vpush %v2717_v31  ;;  %v3626_v31 = vld [vmem:[%s4515_s6 + $0x20] sm:$0xff] }
  0x8b   : >> { %2399 = vpush %v2719_v32  ;;  %v3628_v32 = vshrl.u32 %v472_v35, 7  ;;  %v3644_v35 = vld [vmem:[%s4515_s6 + $0x30] sm:$0xff] }
  0x8c   : >> { %2401 = vpush %v2715_v30  ;;  %v3621_v30 = vld [vmem:[%s4515_s6 + $0x18] sm:$0xff] }
  0x8d   : >> { %4661 = vst [vmem:[#allocation45_spill] sm:$0xff] %v3628_v32  ;;  %vm521_vm4 = vcmp.lt.s32.totalorder %v3628_v32, 7  ;;  %v476_v38 = vadd.s32 24, %v3628_v32  ;;  %vm696_vm15 = vcmp.lt.s32.totalorder %v3628_v32, 1 }
  0x8e   : >> { %v525_v41 = vsel %vm521_vm4, %v520_v36, %v517_v37  ;;  %v522_v53 = vsel %vm521_vm4, %v519_v43, %v520_v36 }
  0x8f   : >> { %vm483_vm5 = vcmp.lt.s32.totalorder %v476_v38, 31 }
  0x90   : >> { %v3669_v47 = vsel %vm483_vm5, 1.0, %v4524_v26 }
  0x91   : >> { %4662 = vst [vmem:[#allocation46_spill] sm:$0xff] %v3669_v47 }
  0xb6   : >> { %s2396_s16 = spop %2395 }
  0xb7   : >> { %v645_v44 = vstv %s2396_s16 }
  0xb8   : >> { %v3576_v45 = vmul.f32 %v666_v39, %v645_v44  ;;  %v766_v46 = vmul.f32 %v3160_v16, %v645_v44  ;;  %v765_v59 = vmul.f32 %v3164_v17, %v645_v44  ;;  %v764_v60 = vmul.f32 %v3168_v18, %v645_v44  ;;  %v3655_v39 = vld [vmem:[%s4515_s6 + $0x38] sm:$0xff] }
  0xb9   : >> { %v3598_v63 = vmul.f32 %v663_v57, %v645_v44  ;;  %v763_v0 = vmul.f32 %v3172_v19, %v645_v44 }
  0xba   : >> { %4657 = vst [vmem:[#allocation41_spill] sm:$0xff] %v3576_v45  ;;  %v770_v49 = vsub.f32 %v3576_v45, %v766_v46  ;;  %v523_v46 = vsel %vm521_vm4, %v518_v40, %v519_v43 }
  0xbb   : >> { %s3581_s17 = spop %2397  ;;  %4660 = vst [vmem:[#allocation44_spill] sm:$0xff] %v3598_v63  ;;  %v767_v3 = vsub.f32 %v3598_v63, %v763_v0  ;;  %v3880_v63 = vld [vmem:[#allocation12 + $0x20] sm:$0xff] }
  0xbc   : >> { %s3587_s22 = spop %2399  ;;  %2267 = vmatprep.subr.mxu0 %v770_v49  ;;  %v550_v48 = vstv %s3581_s17  ;;  %s462_s17 = sld [smem:[#allocation2 + %s3545_s11]]  ;;  %4684 = vst [vmem:[#allocation68_spill] sm:$0xff] %v3880_v63 }
  0xbd   : >> { %s2402_s26 = spop %2401  ;;  %2268 = vmatpush3.msra.mxu0 %v770_v49  ;;  %v527_v49 = vsub.f32 %v3184_v22, %v523_v46  ;;  %v3676_v51 = vmul.f32 %v3152_v14, %v550_v48  ;;  %v3679_v52 = vmul.f32 %v3144_v12, %v550_v48  ;;  %v3700_v0 = vmul.f32 %v3128_v8, %v550_v48  ;;  %s3206_s11 = smov 1   ;;  %v3877_v14 = vld [vmem:[#allocation12 + $0x28] sm:$0xff] }
  0xbe   : >> { %v644_v54 = vstv %s2402_s26  ;;  %v3708_v36 = vmul.f32 %v3148_v13, %v550_v48  ;;  %4683 = vst [vmem:[#allocation67_spill] sm:$0xff] %v3877_v14 }
  0xbf   : >> { %v647_v58 = vsel %vm514_vm3, %v644_v54, %v645_v44  ;;  %v529_v44 = vsub.f32 %v3176_v20, %v525_v41  ;;  %v3686_v54 = vsel %vm492_vm6, 1.0, %v4524_v26 }
  0xc0   : >> { %v3594_v61 = vmul.f32 %v664_v55, %v647_v58  ;;  %v3596_v62 = vmul.f32 %v665_v56, %v647_v58  ;;  %4663 = vst [vmem:[#allocation47_spill] sm:$0xff] %v3686_v54  ;;  %v3689_v55 = vadd.f32 %v3676_v51, %v527_v49 }
  0xc1   : >> { %v533_v50 = vmul.f32 %v3669_v47, %v529_v44  ;;  %v3874_v47 = vld [vmem:[#allocation12 + $0x30] sm:$0xff] }
  0xc2   : >> { %4658 = vst [vmem:[#allocation42_spill] sm:$0xff] %v3594_v61  ;;  %4659 = vst [vmem:[#allocation43_spill] sm:$0xff] %v3596_v62  ;;  %v769_v1 = vsub.f32 %v3596_v62, %v765_v59  ;;  %v768_v2 = vsub.f32 %v3594_v61, %v764_v60  ;;  %v3696_v59 = vmul.f32 %v3136_v10, %v550_v48 }
  0xc3   : >> { %v3692_v57 = vadd.f32 %v3679_v52, %v533_v50  ;;  %4682 = vst [vmem:[#allocation66_spill] sm:$0xff] %v3874_v47 }
  0xc4   : >> { %2269 = vmatprep.subr.mxu0 %v769_v1 }
  0xc5   : >> { %2270 = vmatpush3.msra.mxu0 %v769_v1  ;;  %v570_v41 = vmul.f32 %v3692_v57, %v3692_v57 }
  0xc6   : >> { %2271 = vmatprep.subr.mxu0 %v768_v2 }
  0xc7   : >> { %2272 = vmatpush3.msra.mxu0 %v768_v2  ;;  %v528_v2 = vsub.f32 %v3180_v21, %v522_v53 }
  0xc8   : >> { %2273 = vmatprep.subr.mxu0 %v767_v3 }
  0xc9   : >> { %2274 = vmatpush3.msra.mxu0 %v767_v3  ;;  %v3705_v3 = vmul.f32 %v3156_v15, %v550_v48  ;;  %v3883_v15 = vld [vmem:[#allocation12 + $0x18] sm:$0xff] }
  0xca   : >> { %2276 = vmatmul.mubr.msk.f32.vlgmr.msra.gmra.mxu0 %vm779_vm0, %v3607_v25  ;;  %4685 = vst [vmem:[#allocation69_spill] sm:$0xff] %v3883_v15 }
  0xcb   : >> { %2278 = vmatprep.mubr.msk.f32.mxu0 %vm779_vm0, %v3612_v29 }
  0xce   : >> { %2279 = vmatmul.mubr.msk.f32.gmra.mxu0 %vm779_vm0, %v3621_v30 }
  0xcf   : >> { %2281 = vmatprep.mubr.msk.f32.mxu0 %vm779_vm0, %v3626_v31 }
  0xd2   : >> { %2282 = vmatmul.mubr.msk.f32.gmra.mxu0 %vm779_vm0, %v3637_v34 }
  0xd3   : >> { %2284 = vmatprep.mubr.msk.f32.mxu0 %vm779_vm0, %v3644_v35 }
  0xd6   : >> { %2285 = vmatmul.mubr.msk.f32.gmra.mxu0 %vm779_vm0, %v3655_v39 }
  0xd7   : >> { %2295 = vmatprep.mubr.msk.f32.mxu0 %vm779_vm0, %v3560_v33  ;;  %v524_v33 = vsel %vm521_vm4, %v517_v37, %v518_v40  ;;  %v568_v40 = vmul.f32 %v3689_v55, %v3689_v55 }
  0xd8   : >> { %v526_v1 = vsub.f32 %v3188_v23, %v524_v33 }
  0xda   : >> { %v3725_v53 = vadd.f32 %v3705_v3, %v526_v1 }
  0xe3   : >> { %v537_v42 = vpop.permute.xlu1 %536  ;;  %v541_v56 = vpop.permute.xlu0 %540 }
  0xe4   : >> { %v543_v58 = vsub.f32 %v3184_v22, %v537_v42  ;;  %v545_v60 = vsub.f32 %v3176_v20, %v541_v56  ;;  %v3728_v42 = vmul.f32 %v3140_v11, %v550_v48  ;;  %v3731_v56 = vadd.f32 %v3708_v36, %v528_v2 }
  0xe6   : >> { %v547_v37 = vmul.f32 %v3686_v54, %v543_v58  ;;  %v549_v38 = vmul.f32 %v3686_v54, %v545_v60  ;;  %v3734_v58 = vmul.f32 %v3132_v9, %v550_v48  ;;  %v567_v48 = vmul.f32 %v3725_v53, %v3725_v53 }
  0xe7   : >> { %v535_v43 = vpop.permute.xlu1 %534  ;;  %v539_v44 = vpop.permute.xlu0 %538  ;;  %v607_v9 = vstv %s462_s17  ;;  %s4462_s17 = scalar_lea.hbm (%p4387_p8), %s4518_s9, %s2210_s21 }
  0xe8   : >> { %v3717_v46 = vadd.f32 %v3696_v59, %v547_v37  ;;  %v3720_v49 = vadd.f32 %v3700_v0, %v549_v38  ;;  %v542_v50 = vsub.f32 %v3188_v23, %v535_v43  ;;  %v544_v33 = vsub.f32 %v3180_v21, %v539_v44 }
  0xea   : >> { %v572_v60 = vmul.f32 %v3717_v46, %v3717_v46  ;;  %v574_v37 = vmul.f32 %v3720_v49, %v3720_v49  ;;  %v546_v38 = vmul.f32 %v3686_v54, %v542_v50  ;;  %v548_v1 = vmul.f32 %v3686_v54, %v544_v33 }
  0xeb   : >> { %v569_v50 = vmul.f32 %v3731_v56, %v3731_v56 }
  0xec   : >> { %v576_v43 = vadd.f32 %v572_v60, %v568_v40  ;;  %v578_v44 = vadd.f32 %v574_v37, %v570_v41  ;;  %v3743_v26 = vadd.f32 %v3728_v42, %v546_v38  ;;  %v3746_v2 = vadd.f32 %v3734_v58, %v548_v1 }
  0xee   : >> { %2720 = vrsqrt.f32 %v576_v43  ;;  %v571_v8 = vmul.f32 %v3743_v26, %v3743_v26  ;;  %v573_v40 = vmul.f32 %v3746_v2, %v3746_v2  ;;  %vm588_vm7 = vcmp.eq.f32.partialorder %v576_v43, inf }
  0xef   : >> { %2722 = vrsqrt.f32 %v578_v44  ;;  %v591_v10 = vand.u32 2147483648, %v576_v43  ;;  %vm602_vm8 = vcmp.eq.f32.partialorder %v578_v44, inf  ;;  %v605_v11 = vand.u32 2147483648, %v578_v44 }
  0xf0   : >> { %v575_v41 = vadd.f32 %v571_v8, %v567_v48  ;;  %v577_v33 = vadd.f32 %v573_v40, %v569_v50  ;;  %vm590_vm9 = vcmp.eq.f32.partialorder %v576_v43, 0.0  ;;  %vm604_vm10 = vcmp.eq.f32.partialorder %v578_v44, 0.0 }
  0xf2   : >> { %2724 = vrsqrt.f32 %v575_v41  ;;  %vm595_vm11 = vcmp.eq.f32.partialorder %v577_v33, inf  ;;  %vm581_vm12 = vcmp.eq.f32.partialorder %v575_v41, inf  ;;  %vm583_vm13 = vcmp.eq.f32.partialorder %v575_v41, 0.0 }
  0xf3   : >> { %2726 = vrsqrt.f32 %v577_v33  ;;  %vm597_vm14 = vcmp.eq.f32.partialorder %v577_v33, 0.0 }
  0xfb   : >> { %v2721_v60 = vpop.eup %2720 }
  0xfc   : >> { %v2723_v37 = vpop.eup %2722  ;;  %v587_v38 = vmul.f32 %v2721_v60, %v576_v43  ;;  %v584_v60 = vand.u32 2147483648, %v575_v41 }
  0xfd   : >> { %v601_v1 = vmul.f32 %v2723_v37, %v578_v44  ;;  %v598_v37 = vand.u32 2147483648, %v577_v33 }
  0xfe   : >> { %v589_v54 = vsel %vm588_vm7, %v576_v43, %v587_v38 }
  0xff   : >> { %v2725_v17 = vpop.eup %2724  ;;  %v603_v16 = vsel %vm602_vm8, %v578_v44, %v601_v1  ;;  %v592_v18 = vsel %vm590_vm9, %v591_v10, %v589_v54 }
 0x100   : >> { %v2727_v8 = vpop.eup %2726  ;;  %v606_v48 = vsel %vm604_vm10, %v605_v11, %v603_v16  ;;  %v609_v50 = vsub.f32 %v592_v18, %v607_v9  ;;  %v580_v40 = vmul.f32 %v2725_v17, %v575_v41 }
 0x101   : >> { %v611_v12 = vsub.f32 %v606_v48, %v607_v9  ;;  %v594_v62 = vmul.f32 %v2727_v8, %v577_v33 }
 0x102   : >> { %v613_v45 = vmax.f32 %v609_v50, 0.0  ;;  %v582_v13 = vsel %vm581_vm12, %v575_v41, %v580_v40 }
 0x103   : >> { %v615_v61 = vmax.f32 %v611_v12, 0.0  ;;  %v596_v38 = vsel %vm595_vm11, %v577_v33, %v594_v62  ;;  %v585_v43 = vsel %vm583_vm13, %v584_v60, %v582_v13 }
 0x104   : >> { %v599_v1 = vsel %vm597_vm14, %v598_v37, %v596_v38  ;;  %v617_v44 = vadd.f32 %v613_v45, %v607_v9  ;;  %v608_v10 = vsub.f32 %v585_v43, %v607_v9  ;;  %v3803_v43 = vld [vmem:[#allocation12 + $0xf0] sm:$0xff] }
 0x105   : >> { %v619_v54 = vadd.f32 %v615_v61, %v607_v9  ;;  %v610_v11 = vsub.f32 %v599_v1, %v607_v9  ;;  %v3811_v1 = vld [vmem:[#allocation12 + $0xd8] sm:$0xff] }
 0x106   : >> { %v621_v16 = vadd.f32 1e-05, %v617_v44  ;;  %v612_v18 = vmax.f32 %v608_v10, 0.0  ;;  %v3817_v44 = vld [vmem:[#allocation12 + $0xc8] sm:$0xff]  ;;  %v3820_v10 = vld [vmem:[#allocation12 + $0xc0] sm:$0xff] }
 0x107   : >> { %v623_v17 = vadd.f32 1e-05, %v619_v54  ;;  %v614_v48 = vmax.f32 %v610_v11, 0.0  ;;  %v3823_v54 = vld [vmem:[#allocation12 + $0xb8] sm:$0xff]  ;;  %v3826_v11 = vld [vmem:[#allocation12 + $0xb0] sm:$0xff] }
 0x108   : >> { %2728 = vrcp.f32 %v621_v16  ;;  %v616_v8 = vadd.f32 %v612_v18, %v607_v9  ;;  %v3829_v16 = vld [vmem:[#allocation12 + $0xa8] sm:$0xff] }
 0x109   : >> { %2730 = vrcp.f32 %v623_v17  ;;  %v618_v19 = vadd.f32 %v614_v48, %v607_v9  ;;  %v3835_v17 = vld [vmem:[#allocation12 + $0x98] sm:$0xff] }
 0x10a   : >> { %v620_v50 = vadd.f32 1e-05, %v616_v8  ;;  %4669 = vst [vmem:[#allocation53_spill] sm:$0xff] %v3835_v17  ;;  %v3841_v8 = vld [vmem:[#allocation12 + $0x88] sm:$0xff] }
 0x10b   : >> { %v622_v40 = vadd.f32 1e-05, %v618_v19  ;;  %4671 = vst [vmem:[#allocation55_spill] sm:$0xff] %v3841_v8 }
 0x10c   : >> { %2732 = vrcp.f32 %v620_v50  ;;  %v3844_v50 = vld [vmem:[#allocation12 + $0x80] sm:$0xff] }
 0x10d   : >> { %2734 = vrcp.f32 %v622_v40  ;;  %4672 = vst [vmem:[#allocation56_spill] sm:$0xff] %v3844_v50  ;;  %v3847_v40 = vld [vmem:[#allocation12 + $0x78] sm:$0xff] }
 0x10e   : >> { %4673 = vst [vmem:[#allocation57_spill] sm:$0xff] %v3847_v40 }
 0x115   : >> { %v2729_v12 = vpop.eup %2728 }
 0x116   : >> { %v2731_v62 = vpop.eup %2730  ;;  %v3759_v41 = vmul.f32 %v2729_v12, %v613_v45  ;;  %v3850_v12 = vld [vmem:[#allocation12 + $0x70] sm:$0xff] }
 0x117   : >> { %v3757_v13 = vmul.f32 %v2731_v62, %v615_v61  ;;  %4674 = vst [vmem:[#allocation58_spill] sm:$0xff] %v3850_v12  ;;  %v3853_v62 = vld [vmem:[#allocation12 + $0x68] sm:$0xff] }
 0x118   : >> { %v3773_v19 = vmul.f32 %v3759_v41, %v3717_v46  ;;  %4675 = vst [vmem:[#allocation59_spill] sm:$0xff] %v3853_v62 }
 0x119   : >> { %v2733_v33 = vpop.eup %2732  ;;  %v3763_v60 = vmul.f32 %v3757_v13, %v3720_v49 }
 0x11a   : >> { %v2735_v37 = vpop.eup %2734  ;;  %4665 = vst [vmem:[#allocation49_spill] sm:$0xff] %v3773_v19  ;;  %v3775_v61 = vmul.f32 %v2733_v33, %v612_v18  ;;  %v3832_v18 = vld [vmem:[#allocation12 + $0xa0] sm:$0xff] }
 0x11b   : >> { %4664 = vst [vmem:[#allocation48_spill] sm:$0xff] %v3763_v60  ;;  %v3767_v38 = vsub.f32 %v3763_v60, %v3700_v0  ;;  %v3769_v9 = vmul.f32 %v2735_v37, %v614_v48  ;;  %v3788_v0 = vsub.f32 %v3773_v19, %v3696_v59  ;;  %v3805_v59 = vld [vmem:[#allocation12 + $0xe8] sm:$0xff]  ;;  %4668 = vst [vmem:[#allocation52_spill] sm:$0xff] %v3832_v18  ;;  %v3838_v48 = vld [vmem:[#allocation12 + $0x90] sm:$0xff] }
 0x11c   : >> { %v3792_v46 = vmul.f32 %v3775_v61, %v3743_v26  ;;  %v3808_v26 = vld [vmem:[#allocation12 + $0xe0] sm:$0xff]  ;;  %4670 = vst [vmem:[#allocation54_spill] sm:$0xff] %v3838_v48  ;;  %v3859_v37 = vld [vmem:[#allocation12 + $0x58] sm:$0xff]  ;;  %v3862_v60 = vld [vmem:[#allocation12 + $0x50] sm:$0xff] }
 0x11d   : >> { %711 = vrot.lane.b32.xlu0 %v3767_v38, %s3206_s11  ;;  %v3780_v45 = vmul.f32 %v3769_v9, %v3746_v2  ;;  %v3856_v33 = vld [vmem:[#allocation12 + $0x60] sm:$0xff]  ;;  %4677 = vst [vmem:[#allocation61_spill] sm:$0xff] %v3859_v37  ;;  %4678 = vst [vmem:[#allocation62_spill] sm:$0xff] %v3862_v60 }
 0x11e   : >> { %4667 = vst [vmem:[#allocation51_spill] sm:$0xff] %v3792_v46  ;;  %v3798_v2 = vsub.f32 %v3792_v46, %v3728_v42  ;;  %v3814_v42 = vld [vmem:[#allocation12 + $0xd0] sm:$0xff]  ;;  %4676 = vst [vmem:[#allocation60_spill] sm:$0xff] %v3856_v33  ;;  %v3868_v19 = vld [vmem:[#allocation12 + $0x40] sm:$0xff] }
 0x11f   : >> { %4666 = vst [vmem:[#allocation50_spill] sm:$0xff] %v3780_v45  ;;  %v3784_v49 = vsub.f32 %v3780_v45, %v3734_v58  ;;  %v3801_v58 = vld [vmem:[#allocation12 + $0xf8] sm:$0xff]  ;;  %v3865_v45 = vld [vmem:[#allocation12 + $0x48] sm:$0xff]  ;;  %4680 = vst [vmem:[#allocation64_spill] sm:$0xff] %v3868_v19 }
 0x120   : >> { %941 = vmatprep.subr.mxu1 %v3801_v58  ;;  %4679 = vst [vmem:[#allocation63_spill] sm:$0xff] %v3865_v45  ;;  %v3871_v46 = vld [vmem:[#allocation12 + $0x38] sm:$0xff] }
 0x121   : >> { %709 = vrot.lane.b32.xlu1 %v3784_v49, %s3206_s11  ;;  %707 = vrot.lane.b32.xlu0 %v3788_v0, %s3206_s11  ;;  %4681 = vst [vmem:[#allocation65_spill] sm:$0xff] %v3871_v46 }
 0x122   : >> { %942 = vmatpush1.msra.mxu1 %v3803_v43 }
 0x123   : >> { %943 = vmatprep.subr.mxu1 %v3805_v59 }
 0x124   : >> { %944 = vmatpush1.msra.mxu1 %v3808_v26 }
 0x125   : >> { %705 = vrot.lane.b32.xlu1 %v3798_v2, %s3206_s11  ;;  %945 = vmatprep.subr.mxu1 %v3811_v1  ;;  %s1941_s11 = sshll.u32 (%p4387_p8), %s3407_s15, 4  ;;  %s4465_s11 = int_to_ptr.vmem [resolvable:$true] %s1941_s11 }
 0x126   : >> { %946 = vmatpush1.msra.mxu1 %v3814_v42  ;;  %p2923_p13 = scmp.lt.s32.totalorder (%p4387_p8), %s4465_s11, %s2921_s29 }
 0x127   : >> { %947 = vmatprep.subr.mxu1 %v3817_v44 }
 0x128   : >> { %948 = vmatpush1.msra.mxu1 %v3820_v10 }
 0x129   : >> { %949 = vmatprep.subr.mxu1 %v3823_v54 }
 0x12a   : >> { %950 = vmatpush1.msra.mxu1 %v3826_v11 }
 0x12b   : >> { %951 = vmatprep.subr.mxu1 %v3829_v16 }
 0x12c   : >> { %952 = vmatpush1.msra.mxu1 %v3832_v18 }
 0x12d   : >> { %953 = vmatprep.subr.mxu1 %v3835_v17 }
 0x12e   : >> { %954 = vmatpush1.msra.mxu1 %v3838_v48 }
 0x12f   : >> { %955 = vmatprep.subr.mxu1 %v3841_v8 }
 0x130   : >> { %956 = vmatpush1.msra.mxu1 %v3844_v50 }
 0x131   : >> { %957 = vmatprep.subr.mxu1 %v3847_v40 }
 0x132   : >> { %958 = vmatpush1.msra.mxu1 %v3850_v12 }
 0x133   : >> { %959 = vmatprep.subr.mxu1 %v3853_v62 }
 0x134   : >> { %960 = vmatpush1.msra.mxu1 %v3856_v33 }
 0x135   : >> { %961 = vmatprep.subr.mxu1 %v3859_v37 }
 0x136   : >> { %962 = vmatpush1.msra.mxu1 %v3862_v60 }
 0x137   : >> { %963 = vmatprep.subr.mxu1 %v3865_v45  ;;  %v3889_v45 = vld [vmem:[#allocation12 + $0x8] sm:$0xff] }
 0x138   : >> { %964 = vmatpush1.msra.mxu1 %v3868_v19  ;;  %4687 = vst [vmem:[#allocation71_spill] sm:$0xff] %v3889_v45  ;;  %v3892_v19 = vld [vmem:[#allocation12] sm:$0xff] }
 0x139   : >> { %965 = vmatprep.subr.mxu1 %v3871_v46  ;;  %4688 = vst [vmem:[#allocation72_spill] sm:$0xff] %v3892_v19 }
 0x13a   : >> { %966 = vmatpush1.msra.mxu1 %v3874_v47  ;;  %v671_v47 = vstv %s3587_s22  ;;  %s2916_s22 = scalar_lea.vmem (%p4387_p8), %s4465_s11, 256 }
 0x13b   : >> { %967 = vmatprep.subr.mxu1 %v3877_v14  ;;  %v3900_v14 = vmul.f32 %v3769_v9, %v3731_v56  ;;  %v675_v46 = vmul.f32 %v3112_v4, %v671_v47  ;;  %v674_v56 = vmul.f32 %v3116_v5, %v671_v47  ;;  %p2917_p11 = scmp.ne.s32.totalorder (%p4387_p8), %s4465_s11, %s2916_s22  ;;  %p2924_p3 = scmp.lt.s32.totalorder (%p4387_p8), %s2922_s14, %s2916_s22 }
 0x13c   : >> { %968 = vmatpush1.msra.mxu1 %v3880_v63  ;;  %v3905_v63 = vmul.f32 %v3757_v13, %v3692_v57 }
 0x13d   : >> { %969 = vmatprep.subr.mxu1 %v3883_v15  ;;  %4689 = vst [vmem:[#allocation73_spill] sm:$0xff] %v3900_v14  ;;  %v3909_v15 = vmul.f32 %v3775_v61, %v3725_v53  ;;  %v3919_v9 = vadd.f32 %v3176_v20, %v675_v46  ;;  %v672_v61 = vmul.f32 %v3124_v7, %v671_v47  ;;  %p2918_p1 = pnand (%p4387_p8), %p2917_p11, %p3298_p5  ;;  %p2925_p2 = por (%p4387_p8), %p2924_p3, %p2923_p13 }
 0x13e   : >> { %970 = vmatpush1.msra.mxu1 %v3886_v24  ;;  %4690 = vst [vmem:[#allocation74_spill] sm:$0xff] %v3905_v63  ;;  %v687_v57 = vsub.f32 %v3905_v63, %v3679_v52 }
 0x13f   : >> { %971 = vmatprep.subr.mxu1 %v3889_v45  ;;  %4691 = vst [vmem:[#allocation75_spill] sm:$0xff] %v3909_v15  ;;  %v686_v45 = vsub.f32 %v3900_v14, %v3708_v36  ;;  %4693 = vst [vmem:[#allocation77_spill] sm:$0xff] %v3919_v9  ;;  %v684_v13 = vsub.f32 %v3909_v15, %v3705_v3  ;;  %v673_v36 = vmul.f32 %v3120_v6, %v671_v47  ;;  %p2919_p0 = pneg (%p4387_p8), %p2918_p1 }
 0x140   : >> { %972 = vmatpush1.msra.mxu1 %v3892_v19  ;;  %v3915_v19 = vmul.f32 %v3759_v41, %v3689_v55  ;;  %v3931_v41 = vadd.f32 %v3180_v21, %v674_v56  ;;  %v4580_v20 = vmax.f32 %v3919_v9, 0.0  ;;  %v695_v46 = vrot.slane %v687_v57, 7 }
 0x141   : >> { %v694_v53 = vrot.slane %v686_v45, 7  ;;  %v692_v52 = vrot.slane %v684_v13, 7  ;;  %v3937_v14 = vadd.f32 %v3188_v23, %v672_v61  ;;  %v3940_v47 = vadd.f32 %v3184_v22, %v673_v36  ;;  %p2926_p4 = pnand (%p4387_p8), %p2925_p2, %p2919_p0 }
 0x142   : >> { %4692 = vst [vmem:[#allocation76_spill] sm:$0xff] %v3915_v19  ;;  %v685_v55 = vsub.f32 %v3915_v19, %v3676_v51  ;;  %4694 = vst [vmem:[#allocation78_spill] sm:$0xff] %v3931_v41  ;;  %v1065_v21 = vmul.f32 %v4580_v20, %v3554_v28  ;;  %v4697_v23 = vmov 0.0  }
 0x143   : >> { %v697_v3 = vsel %vm696_vm15, %v694_v53, %v695_v46  ;;  %4695 = vst [vmem:[#allocation79_spill] sm:$0xff] %v3937_v14  ;;  %4696 = vst [vmem:[#allocation80_spill] sm:$0xff] %v3940_v47 }
 0x144   : >> { %v693_v15 = vrot.slane %v685_v55, 7  ;;  %v704_v24 = vsub.f32 %v687_v57, %v697_v3  ;;  %v4698_v3 = vmax.f32 %v3931_v41, 0.0 }
 0x146   : >> { %v699_v37 = vsel %vm696_vm15, %v692_v52, %v693_v15  ;;  %v698_v22 = vsel %vm696_vm15, %v693_v15, %v694_v53  ;;  %v1064_v15 = vmul.f32 %v4698_v3, %v3554_v28 }
 0x147   : >> { %v702_v33 = vsub.f32 %v685_v55, %v699_v37 }
 0x18a   : >> { %v2277_v63 = vpop.f32.mrf.mxu0 }
 0x18c   : >> { %v870_v56 = vpop.f32.mrf.mxu0 }
 0x18d   : >> { %1006 = vmatmul.mubr.f32.vlgmr.msra.gmra.mxu1 %v870_v56  ;;  %v703_v56 = vsub.f32 %v686_v45, %v698_v22  ;;  %v4700_v45 = vmax.f32 %v3937_v14, 0.0 }
 0x18e   : >> { %1011 = vmatprep.mubr.f32.mxu1 %v4697_v23  ;;  %v2280_v61 = vpop.f32.mrf.mxu0 }
 0x18f   : >> { %v712_v19 = vpop.permute.xlu0 %711 }
 0x190   : >> { %v716_v60 = vsub.f32 %v3767_v38, %v712_v19  ;;  %v700_v38 = vsel %vm696_vm15, %v695_v46, %v692_v52  ;;  %v1069_v19 = vsub.f32 %v1065_v21, %v3112_v4  ;;  %v4699_v46 = vmax.f32 %v3940_v47, 0.0  ;;  %v4714_v4 = vld [vmem:[#allocation38_spill] sm:$0xff]  ;;  %v730_v47 = vld [vmem:[#allocation7 + $0x8] sm:$0xff] }
 0x191   : >> { %1012 = vmatmul.mubr.f32.gmra.mxu1 %v2277_v63  ;;  %v701_v3 = vsub.f32 %v684_v13, %v700_v38 }
 0x192   : >> { %v720_v9 = vadd.f32 %v716_v60, %v704_v24  ;;  %v880_v24 = vpop.f32.mrf.mxu0  ;;  %1017 = vmatprep.mubr.f32.mxu1 %v4697_v23  ;;  %v1063_v52 = vmul.f32 %v4699_v46, %v3554_v28 }
 0x193   : >> { %v710_v20 = vpop.permute.xlu1 %709  ;;  %v708_v57 = vpop.permute.xlu0 %707 }
 0x194   : >> { %v1073_v53 = vmul.f32 %v720_v9, %v3551_v27  ;;  %v715_v36 = vsub.f32 %v3784_v49, %v710_v20  ;;  %v714_v51 = vsub.f32 %v3788_v0, %v708_v57  ;;  %v1068_v9 = vsub.f32 %v1064_v15, %v3116_v5 }
 0x195   : >> { %v1062_v49 = vmul.f32 %v4700_v45, %v3554_v28  ;;  %1018 = vmatmul.mubr.f32.gmra.mxu1 %v880_v24  ;;  %v1067_v22 = vsub.f32 %v1063_v52, %v3120_v6  ;;  %v4710_v24 = vld [vmem:[#allocation69_spill] sm:$0xff] }
 0x196   : >> { %v719_v60 = vadd.f32 %v715_v36, %v703_v56  ;;  %v718_v37 = vadd.f32 %v714_v51, %v702_v33  ;;  %v1077_v55 = vadd.f32 %v1073_v53, %v1069_v19  ;;  %1023 = vmatprep.mubr.f32.mxu1 %v4697_v23  ;;  %v2283_v33 = vpop.f32.mrf.mxu0  ;;  %v4708_v53 = vld [vmem:[#allocation67_spill] sm:$0xff]  ;;  %v4709_v56 = vld [vmem:[#allocation68_spill] sm:$0xff] }
 0x197   : >> { %v706_v21 = vpop.permute.xlu1 %705  ;;  %v1066_v38 = vsub.f32 %v1062_v49, %v3124_v7  ;;  %v738_v7 = vld [vmem:[#allocation9 + $0x8] sm:$0xff] }
 0x198   : >> { %v1072_v63 = vmul.f32 %v719_v60, %v3551_v27  ;;  %v1071_v0 = vmul.f32 %v718_v37, %v3551_v27  ;;  %v713_v20 = vsub.f32 %v3798_v2, %v706_v21  ;;  %2287 = vmatprep.subr.mxu0 %v1077_v55  ;;  %v890_v19 = vpop.f32.mrf.mxu0  ;;  %v4711_v60 = vld [vmem:[#allocation70_spill] sm:$0xff]  ;;  %v4712_v37 = vld [vmem:[#allocation71_spill] sm:$0xff] }
 0x199   : >> { %2288 = vmatpush3.msra.mxu0 %v1077_v55  ;;  %1024 = vmatmul.mubr.f32.gmra.mxu1 %v2280_v61  ;;  %v4713_v55 = vld [vmem:[#allocation72_spill] sm:$0xff] }
 0x19a   : >> { %v717_v51 = vadd.f32 %v713_v20, %v701_v3  ;;  %v1076_v13 = vadd.f32 %v1072_v63, %v1068_v9  ;;  %v1075_v57 = vadd.f32 %v1071_v0, %v1067_v22  ;;  %1029 = vmatprep.mubr.f32.mxu1 %v4697_v23  ;;  %v2286_v15 = vpop.f32.mrf.mxu0  ;;  %v4070_v0 = vld [vmem:[#allocation10] sm:$0xff] }
 0x19c   : >> { %v1070_v36 = vmul.f32 %v717_v51, %v3551_v27  ;;  %2289 = vmatprep.subr.mxu0 %v1076_v13  ;;  %v900_v61 = vpop.f32.mrf.mxu0 }
 0x19d   : >> { %2290 = vmatpush3.msra.mxu0 %v1076_v13  ;;  %1030 = vmatmul.mubr.f32.gmra.mxu1 %v890_v19 }
 0x19e   : >> { %2291 = vmatprep.subr.mxu0 %v1075_v57  ;;  %v1074_v2 = vadd.f32 %v1070_v36, %v1066_v38  ;;  %1035 = vmatprep.mubr.f32.mxu1 %v4697_v23 }
 0x19f   : >> { %2292 = vmatpush3.msra.mxu0 %v1075_v57 }
 0x1a0   : >> { %2293 = vmatprep.subr.mxu0 %v1074_v2 }
 0x1a1   : >> { %2294 = vmatpush3.msra.mxu0 %v1074_v2  ;;  %1036 = vmatmul.mubr.f32.gmra.mxu1 %v2283_v33 }
 0x1a2   : >> { %2296 = vmatmul.mubr.msk.f32.vlgmr.msra.gmra.mxu0 %vm779_vm0, %v3607_v25  ;;  %1183 = vmatprep.subr.mxu0 %v3801_v58  ;;  %v4701_v25 = vld [vmem:[#allocation60_spill] sm:$0xff] }
 0x1a3   : >> { %2298 = vmatprep.mubr.msk.f32.mxu0 %vm779_vm0, %v3612_v29  ;;  %1184 = vmatpush1.msra.mxu0 %v3803_v43  ;;  %v4702_v29 = vld [vmem:[#allocation61_spill] sm:$0xff] }
 0x1a4   : >> { %1185 = vmatprep.subr.mxu0 %v3805_v59  ;;  %1041 = vmatprep.mubr.f32.mxu1 %v4697_v23 }
 0x1a5   : >> { %1186 = vmatpush1.msra.mxu0 %v3808_v26  ;;  %1042 = vmatmul.mubr.f32.gmra.mxu1 %v900_v61 }
 0x1a6   : >> { %2299 = vmatmul.mubr.msk.f32.gmra.mxu0 %vm779_vm0, %v3621_v30  ;;  %1187 = vmatprep.subr.mxu0 %v3811_v1  ;;  %v4703_v30 = vld [vmem:[#allocation62_spill] sm:$0xff] }
 0x1a7   : >> { %2301 = vmatprep.mubr.msk.f32.mxu0 %vm779_vm0, %v3626_v31  ;;  %1188 = vmatpush1.msra.mxu0 %v3814_v42  ;;  %v4704_v31 = vld [vmem:[#allocation63_spill] sm:$0xff] }
 0x1a8   : >> { %1189 = vmatprep.subr.mxu0 %v3817_v44  ;;  %1047 = vmatprep.mubr.f32.mxu1 %v4697_v23 }
 0x1a9   : >> { %1190 = vmatpush1.msra.mxu0 %v3820_v10  ;;  %1048 = vmatmul.mubr.f32.gmra.mxu1 %v2286_v15 }
 0x1aa   : >> { %2302 = vmatmul.mubr.msk.f32.gmra.mxu0 %vm779_vm0, %v3637_v34  ;;  %1191 = vmatprep.subr.mxu0 %v3823_v54  ;;  %v4705_v34 = vld [vmem:[#allocation64_spill] sm:$0xff] }
 0x1ab   : >> { %2304 = vmatprep.mubr.msk.f32.mxu0 %vm779_vm0, %v3644_v35  ;;  %1192 = vmatpush1.msra.mxu0 %v3826_v11  ;;  %v4706_v35 = vld [vmem:[#allocation65_spill] sm:$0xff] }
 0x1ac   : >> { %1193 = vmatprep.subr.mxu0 %v3829_v16 }
 0x1ad   : >> { %1194 = vmatpush1.msra.mxu0 %v3832_v18 }
 0x1ae   : >> { %2305 = vmatmul.mubr.msk.f32.gmra.mxu0 %vm779_vm0, %v3655_v39  ;;  %1195 = vmatprep.subr.mxu0 %v3835_v17  ;;  %v4707_v39 = vld [vmem:[#allocation66_spill] sm:$0xff]  ;;  %vm1360_vm0 = vcmask 523264  }
 0x1af   : >> { %1196 = vmatpush1.msra.mxu0 %v3838_v48  ;;  %1247 = vmatprep.mubr.f32.mxu0 %v4697_v23 }
 0x1b0   : >> { %1197 = vmatprep.subr.mxu0 %v3841_v8  ;;  %2323 = vmatprep.mubr.msk.f32.mxu1 %vm1360_vm0, %v4070_v0 }
 0x1b1   : >> { %1198 = vmatpush1.msra.mxu0 %v3844_v50 }
 0x1b2   : >> { %1199 = vmatprep.subr.mxu0 %v3847_v40 }
 0x1b3   : >> { %1200 = vmatpush1.msra.mxu0 %v3850_v12 }
 0x1b4   : >> { %1201 = vmatprep.subr.mxu0 %v3853_v62 }
 0x1b5   : >> { %1202 = vmatpush1.msra.mxu0 %v4701_v25 }
 0x1b6   : >> { %1203 = vmatprep.subr.mxu0 %v4702_v29 }
 0x1b7   : >> { %1204 = vmatpush1.msra.mxu0 %v4703_v30 }
 0x1b8   : >> { %1205 = vmatprep.subr.mxu0 %v4704_v31 }
 0x1b9   : >> { %1206 = vmatpush1.msra.mxu0 %v4705_v34 }
 0x1ba   : >> { %1207 = vmatprep.subr.mxu0 %v4706_v35 }
 0x1bb   : >> { %1208 = vmatpush1.msra.mxu0 %v4707_v39 }
 0x1bc   : >> { %1209 = vmatprep.subr.mxu0 %v4708_v53 }
 0x1bd   : >> { %1210 = vmatpush1.msra.mxu0 %v4709_v56 }
 0x1be   : >> { %1211 = vmatprep.subr.mxu0 %v4710_v24 }
 0x1bf   : >> { %1212 = vmatpush1.msra.mxu0 %v4711_v60 }
 0x1c0   : >> { %1213 = vmatprep.subr.mxu0 %v4712_v37 }
 0x1c1   : >> { %1214 = vmatpush1.msra.mxu0 %v4713_v55 }
 0x1c2   : >> { %1490 = vmatprep.subr.mxu0 %v3801_v58 }
 0x24d   : >> { %v4074_v20 = vpop.f32.mrf.mxu1 }
 0x24f   : >> { %v1009_v33 = vpop.f32.mrf.mxu1 }
 0x251   : >> { %v1013_v51 = vpop.f32.mrf.mxu1 }
 0x253   : >> { %v1015_v13 = vpop.f32.mrf.mxu1 }
 0x255   : >> { %v1019_v22 = vpop.f32.mrf.mxu1 }
 0x257   : >> { %v1021_v36 = vpop.f32.mrf.mxu1 }
 0x259   : >> { %v1025_v57 = vpop.f32.mrf.mxu1 }
 0x25b   : >> { %v1027_v38 = vpop.f32.mrf.mxu1 }
 0x25d   : >> { %v1031_v19 = vpop.f32.mrf.mxu1 }
 0x25f   : >> { %v1033_v2 = vpop.f32.mrf.mxu1 }
 0x261   : >> { %v1037_v15 = vpop.f32.mrf.mxu1 }
 0x262   : >> { %v2297_v46 = vpop.f32.mrf.mxu0 }
 0x263   : >> { %v1039_v61 = vpop.f32.mrf.mxu1 }
 0x264   : >> { %v1144_v52 = vpop.f32.mrf.mxu0 }
 0x265   : >> { %1248 = vmatmul.mubr.f32.vlgmr.msra.gmra.mxu0 %v1144_v52  ;;  %v1043_v52 = vpop.f32.mrf.mxu1 }
 0x266   : >> { %1253 = vmatprep.mubr.f32.mxu0 %v4697_v23  ;;  %1491 = vmatpush1.msra.mxu0 %v3803_v43  ;;  %v2300_v21 = vpop.f32.mrf.mxu0 }
 0x267   : >> { %1492 = vmatprep.subr.mxu0 %v3805_v59  ;;  %v1045_v6 = vpop.f32.mrf.mxu1 }
 0x268   : >> { %1493 = vmatpush1.msra.mxu0 %v3808_v26  ;;  %v1154_v3 = vpop.f32.mrf.mxu0 }
 0x269   : >> { %1254 = vmatmul.mubr.f32.gmra.mxu0 %v2297_v46  ;;  %1494 = vmatprep.subr.mxu0 %v3811_v1 }
 0x26a   : >> { %1259 = vmatprep.mubr.f32.mxu0 %v4697_v23  ;;  %1495 = vmatpush1.msra.mxu0 %v3814_v42  ;;  %v2303_v9 = vpop.f32.mrf.mxu0 }
 0x26b   : >> { %1496 = vmatprep.subr.mxu0 %v3817_v44 }
 0x26c   : >> { %1497 = vmatpush1.msra.mxu0 %v3820_v10  ;;  %v1164_v45 = vpop.f32.mrf.mxu0 }
 0x26d   : >> { %1260 = vmatmul.mubr.f32.gmra.mxu0 %v1154_v3  ;;  %1498 = vmatprep.subr.mxu0 %v3823_v54  ;;  %v732_v3 = vld [vmem:[#allocation7 + $0x18] sm:$0xff] }
 0x26e   : >> { %1265 = vmatprep.mubr.f32.mxu0 %v4697_v23  ;;  %1499 = vmatpush1.msra.mxu0 %v3826_v11  ;;  %v2306_v49 = vpop.f32.mrf.mxu0  ;;  %v736_v5 = vmul.f32 %v732_v3, %v4714_v4 }
 0x26f   : >> { %1500 = vmatprep.subr.mxu0 %v3829_v16 }
 0x270   : >> { %1501 = vmatpush1.msra.mxu0 %v3832_v18  ;;  %v1174_v63 = vpop.f32.mrf.mxu0 }
 0x271   : >> { %1266 = vmatmul.mubr.f32.gmra.mxu0 %v2300_v21  ;;  %1502 = vmatprep.subr.mxu0 %v3835_v17 }
 0x272   : >> { %1271 = vmatprep.mubr.f32.mxu0 %v4697_v23  ;;  %1503 = vmatpush1.msra.mxu0 %v3838_v48 }
 0x273   : >> { %1504 = vmatprep.subr.mxu0 %v3841_v8 }
 0x274   : >> { %1505 = vmatpush1.msra.mxu0 %v3844_v50 }
 0x275   : >> { %1272 = vmatmul.mubr.f32.gmra.mxu0 %v1164_v45  ;;  %1506 = vmatprep.subr.mxu0 %v3847_v40 }
 0x276   : >> { %1277 = vmatprep.mubr.f32.mxu0 %v4697_v23  ;;  %1507 = vmatpush1.msra.mxu0 %v3850_v12  ;;  %v1060_v12 = vadd.f32 %v1043_v52, %v1021_v36  ;;  %v4122_v36 = vld [vmem:[#allocation6 + $0x8] sm:$0xff] }
 0x277   : >> { %1508 = vmatprep.subr.mxu0 %v3853_v62 }
 0x278   : >> { %1509 = vmatpush1.msra.mxu0 %v4701_v25 }
 0x279   : >> { %1278 = vmatmul.mubr.f32.gmra.mxu0 %v2303_v9  ;;  %1510 = vmatprep.subr.mxu0 %v4702_v29  ;;  %v740_v9 = vld [vmem:[#allocation9 + $0x18] sm:$0xff] }
 0x27a   : >> { %1283 = vmatprep.mubr.f32.mxu0 %v4697_v23  ;;  %1511 = vmatpush1.msra.mxu0 %v4703_v30  ;;  %v745_v41 = vmul.f32 %v740_v9, %v3551_v27 }
 0x27b   : >> { %1512 = vmatprep.subr.mxu0 %v4704_v31 }
 0x27c   : >> { %1513 = vmatpush1.msra.mxu0 %v4705_v34  ;;  %v749_v3 = vadd.f32 %v745_v41, %v736_v5  ;;  %v4101_v41 = vld [vmem:[%s4511_s2 + $0x10] sm:$0xff] }
 0x27d   : >> { %1284 = vmatmul.mubr.f32.gmra.mxu0 %v1174_v63  ;;  %1514 = vmatprep.subr.mxu0 %v4706_v35  ;;  %v739_v63 = vld [vmem:[#allocation9 + $0x10] sm:$0xff] }
 0x27e   : >> { %1289 = vmatprep.mubr.f32.mxu0 %v4697_v23  ;;  %1515 = vmatpush1.msra.mxu0 %v4707_v39  ;;  %v1049_v39 = vpop.f32.mrf.mxu1 }
 0x27f   : >> { %1516 = vmatprep.subr.mxu0 %v4708_v53  ;;  %v743_v53 = vmul.f32 %v738_v7, %v3551_v27  ;;  %v1056_v7 = vsub.f32 %v1019_v22, %v1045_v6  ;;  %v4120_v22 = vld [vmem:[%s4511_s2 + $0x8] sm:$0xff] }
 0x280   : >> { %1517 = vmatpush1.msra.mxu0 %v4709_v56  ;;  %v734_v56 = vmul.f32 %v730_v47, %v4714_v4  ;;  %v1051_v29 = vpop.f32.mrf.mxu1 }
 0x281   : >> { %1290 = vmatmul.mubr.f32.gmra.mxu0 %v2306_v49  ;;  %1518 = vmatprep.subr.mxu0 %v4710_v24  ;;  %v731_v49 = vld [vmem:[#allocation7 + $0x10] sm:$0xff]  ;;  %v737_v24 = vld [vmem:[#allocation9] sm:$0xff] }
 0x282   : >> { %1519 = vmatpush1.msra.mxu0 %v4711_v60  ;;  %1554 = vmatprep.mubr.f32.mxu0 %v4697_v23  ;;  %v735_v14 = vmul.f32 %v731_v49, %v4714_v4  ;;  %v729_v60 = vld [vmem:[#allocation7] sm:$0xff]  ;;  %v742_v34 = vmul.f32 %v737_v24, %v3551_v27  ;;  %v747_v49 = vadd.f32 %v743_v53, %v734_v56  ;;  %v4104_v53 = vld [vmem:[#allocation6 + $0x10] sm:$0xff] }
 0x283   : >> { %1520 = vmatprep.subr.mxu0 %v4712_v37  ;;  %v733_v35 = vmul.f32 %v729_v60, %v4714_v4  ;;  %v1061_v24 = vadd.f32 %v1049_v39, %v1027_v38  ;;  %v1055_v56 = vsub.f32 %v1013_v51, %v1039_v61  ;;  %v1054_v39 = vsub.f32 %v4074_v20, %v1033_v2  ;;  %v4128_v51 = vld [vmem:[%s4511_s2] sm:$0xff] }
 0x284   : >> { %1521 = vmatpush1.msra.mxu0 %v4713_v55  ;;  %v744_v55 = vmul.f32 %v739_v63, %v3551_v27  ;;  %v754_v63 = vadd.f32 %v749_v3, %v3554_v28  ;;  %v752_v60 = vadd.f32 %v747_v49, %v3554_v28  ;;  %v1310_v8 = vmul.f32 %v1060_v12, %v4104_v53 }
 0x285   : >> { %1732 = vmatprep.subr.mxu0 %v3801_v58  ;;  %v746_v62 = vadd.f32 %v742_v34, %v733_v35  ;;  %v4109_v34 = vld [vmem:[%s4511_s2 + $0x18] sm:$0xff]  ;;  %v1059_v35 = vadd.f32 %v1037_v15, %v1015_v13  ;;  %v1333_v15 = vmul.f32 %v1055_v56, %v4122_v36  ;;  %v1306_v23 = vmul.f32 %v1056_v7, %v4101_v41 }
 0x286   : >> { %v748_v31 = vadd.f32 %v744_v55, %v735_v14  ;;  %v1057_v14 = vsub.f32 %v1025_v57, %v1051_v29  ;;  %2736 = vrcp.f32 %v754_v63  ;;  %v1058_v29 = vadd.f32 %v1031_v19, %v1009_v33 }
 0x287   : >> { %v751_v55 = vadd.f32 %v746_v62, %v3554_v28  ;;  %v1330_v57 = vmul.f32 %v1060_v12, %v4101_v41  ;;  %v4130_v62 = vld [vmem:[#allocation6] sm:$0xff]  ;;  %v1334_v33 = vmul.f32 %v1056_v7, %v4104_v53  ;;  %v1331_v20 = vmul.f32 %v1061_v24, %v4109_v34 }
 0x288   : >> { %v753_v47 = vadd.f32 %v748_v31, %v3554_v28  ;;  %v4111_v31 = vld [vmem:[#allocation6 + $0x18] sm:$0xff]  ;;  %v1329_v2 = vmul.f32 %v1059_v35, %v4120_v22  ;;  %v1328_v61 = vmul.f32 %v1058_v29, %v4128_v51  ;;  %v1332_v52 = vmul.f32 %v1054_v39, %v4130_v62 }
 0x289   : >> { %v1335_v13 = vmul.f32 %v1057_v14, %v4111_v31  ;;  %v1338_v49 = vsub.f32 %v1330_v57, %v1334_v33  ;;  %v1307_v27 = vmul.f32 %v1057_v14, %v4109_v34  ;;  %v1305_v14 = vmul.f32 %v1055_v56, %v4120_v22 }
 0x28a   : >> { %2738 = vrcp.f32 %v753_v47  ;;  %v1311_v47 = vmul.f32 %v1061_v24, %v4111_v31  ;;  %v1336_v50 = vsub.f32 %v1328_v61, %v1332_v52  ;;  %v1309_v24 = vmul.f32 %v1059_v35, %v4122_v36 }
 0x28b   : >> { %2740 = vrcp.f32 %v752_v60  ;;  %v1339_v63 = vsub.f32 %v1331_v20, %v1335_v13  ;;  %v1337_v60 = vsub.f32 %v1329_v2, %v1333_v15  ;;  %v1342_v17 = vmul.f32 %v1338_v49, %v4714_v4 }
 0x28c   : >> { %2742 = vrcp.f32 %v751_v55  ;;  %v1315_v20 = vadd.f32 %v1311_v47, %v1307_v27  ;;  %v1340_v61 = vmul.f32 %v1336_v50, %v4714_v4 }
 0x28d   : >> { %v1343_v57 = vmul.f32 %v1339_v63, %v4714_v4  ;;  %v1341_v12 = vmul.f32 %v1337_v60, %v4714_v4 }
 0x293   : >> { %v2737_v33 = vpop.eup %2736 }
 0x297   : >> { %v2739_v15 = vpop.eup %2738 }
 0x298   : >> { %v2741_v56 = vpop.eup %2740 }
 0x325   : >> { %v4076_v46 = vpop.f32.mrf.mxu0 }
 0x327   : >> { %v4078_v21 = vpop.f32.mrf.mxu0 }
 0x329   : >> { %v4080_v45 = vpop.f32.mrf.mxu0 }
 0x32b   : >> { %v4084_v32 = vpop.f32.mrf.mxu0 }
 0x32d   : >> { %v4088_v37 = vpop.f32.mrf.mxu0 }
 0x32f   : >> { %v1263_v9 = vpop.f32.mrf.mxu0 }
 0x331   : >> { %v4094_v30 = vpop.f32.mrf.mxu0 }
 0x333   : >> { %v1269_v25 = vpop.f32.mrf.mxu0 }
 0x335   : >> { %v1273_v5 = vpop.f32.mrf.mxu0 }
 0x336   : >> { %v1300_v13 = vadd.f32 %v1273_v5, %v4078_v21 }
 0x337   : >> { %v4113_v6 = vpop.f32.mrf.mxu0 }
 0x338   : >> { %v1344_v21 = vadd.f32 %v1340_v61, %v1300_v13 }
 0x339   : >> { %v1279_v38 = vpop.f32.mrf.mxu0 }
 0x33a   : >> { %v1301_v48 = vadd.f32 %v1279_v38, %v4084_v32  ;;  %v1308_v32 = vmul.f32 %v1058_v29, %v4130_v62  ;;  %v1314_v38 = vadd.f32 %v1310_v8, %v1306_v23 }
 0x33b   : >> { %v4135_v19 = vpop.f32.mrf.mxu0 }
 0x33c   : >> { %v1345_v52 = vadd.f32 %v1341_v12, %v1301_v48  ;;  %v1297_v50 = vsub.f32 %v4080_v45, %v4135_v19  ;;  %v1318_v23 = vmul.f32 %v1314_v38, %v4714_v4 }
 0x33d   : >> { %v1285_v3 = vpop.f32.mrf.mxu0 }
 0x33e   : >> { %v1302_v40 = vadd.f32 %v1285_v3, %v1263_v9  ;;  %v1313_v3 = vadd.f32 %v1309_v24, %v1305_v14  ;;  %v4164_v48 = vmul.f32 %v2741_v56, %v1345_v52 }
 0x33f   : >> { %v1287_v28 = vpop.f32.mrf.mxu0 }
 0x340   : >> { %v1346_v7 = vadd.f32 %v1342_v17, %v1302_v40  ;;  %v1319_v17 = vmul.f32 %v1315_v20, %v4714_v4  ;;  %v2743_v40 = vpop.eup %2742  ;;  %v1317_v29 = vmul.f32 %v1313_v3, %v4714_v4  ;;  %v1354_v20 = vld [vmem:[#allocation10 + $0x10] sm:$0xff]  ;;  %v1616_v12 = vmul.f32 %v4164_v48, %v4120_v22 }
 0x341   : >> { %v1291_v55 = vpop.f32.mrf.mxu0 }
 0x342   : >> { %v1303_v18 = vadd.f32 %v1291_v55, %v1269_v25  ;;  %v1304_v25 = vmul.f32 %v1054_v39, %v4128_v51  ;;  %v4158_v5 = vmul.f32 %v2739_v15, %v1346_v7  ;;  %v1321_v19 = vadd.f32 %v1317_v29, %v1297_v50  ;;  %v4733_v50 = vld [vmem:[#allocation69_spill] sm:$0xff] }
 0x343   : >> { %v1293_v9 = vpop.f32.mrf.mxu0 }
 0x344   : >> { %v1347_v2 = vadd.f32 %v1343_v57, %v1303_v18  ;;  %v1299_v27 = vsub.f32 %v4094_v30, %v1293_v9  ;;  %v1298_v18 = vsub.f32 %v4088_v37, %v1287_v28  ;;  %v1312_v8 = vadd.f32 %v1308_v32, %v1304_v25  ;;  %v1356_v25 = vld [vmem:[#allocation10 + $0x20] sm:$0xff] }
 0x345   : >> { %v4171_v28 = vmul.f32 %v2743_v40, %v1344_v21  ;;  %v1296_v37 = vsub.f32 %v4076_v46, %v4113_v6  ;;  %v1325_v46 = vmul.f32 %v2741_v56, %v1321_v19  ;;  %v1617_v14 = vmul.f32 %v4158_v5, %v4101_v41  ;;  %v1357_v56 = vld [vmem:[#allocation10 + $0x28] sm:$0xff] }
 0x346   : >> { %v4155_v35 = vmul.f32 %v2737_v33, %v1347_v2  ;;  %v1323_v30 = vadd.f32 %v1319_v17, %v1299_v27  ;;  %v1322_v39 = vadd.f32 %v1318_v23, %v1298_v18  ;;  %v1316_v45 = vmul.f32 %v1312_v8, %v4714_v4  ;;  %v1355_v2 = vld [vmem:[#allocation10 + $0x18] sm:$0xff]  ;;  %v4731_v8 = vld [vmem:[#allocation67_spill] sm:$0xff]  ;;  %v4734_v23 = vld [vmem:[#allocation70_spill] sm:$0xff] }
 0x347   : >> { %v1620_v9 = vmul.f32 %v1325_v46, %v4122_v36  ;;  %v1615_v32 = vmul.f32 %v4171_v28, %v4128_v51  ;;  %v1609_v21 = vmul.f32 %v4158_v5, %v4104_v53  ;;  %v1604_v18 = vmul.f32 %v1325_v46, %v4120_v22  ;;  %v2745_v19 = vld [vmem:[#allocation12 + $0xe8] sm:$0xff] }
 0x348   : >> { %2307 = vmatprep.subr.mxu1 %v4155_v35  ;;  %v1327_v49 = vmul.f32 %v2737_v33, %v1323_v30  ;;  %v1320_v63 = vadd.f32 %v1316_v45, %v1296_v37  ;;  %v1326_v47 = vmul.f32 %v2739_v15, %v1322_v39  ;;  %v1618_v55 = vmul.f32 %v4155_v35, %v4109_v34  ;;  %v1353_v33 = vld [vmem:[#allocation10 + $0x8] sm:$0xff]  ;;  %v2744_v45 = vld [vmem:[#allocation12 + $0xf0] sm:$0xff] }
 0x349   : >> { %2308 = vmatpush3.msra.mxu1 %v4155_v35  ;;  %v1624_v15 = vadd.f32 %v1620_v9, %v1616_v12  ;;  %v1610_v52 = vmul.f32 %v4155_v35, %v4111_v31  ;;  %v1359_v35 = vld [vmem:[#allocation10 + $0x38] sm:$0xff]  ;;  %v4735_v30 = vld [vmem:[#allocation71_spill] sm:$0xff] }
 0x34a   : >> { %2309 = vmatprep.subr.mxu1 %v4158_v5  ;;  %v1622_v6 = vmul.f32 %v1327_v49, %v4111_v31  ;;  %v1324_v60 = vmul.f32 %v2743_v40, %v1320_v63  ;;  %v1621_v57 = vmul.f32 %v1326_v47, %v4104_v53  ;;  %v1606_v38 = vmul.f32 %v1327_v49, %v4109_v34  ;;  %v1358_v34 = vld [vmem:[#allocation10 + $0x30] sm:$0xff]  ;;  %v2746_v63 = vld [vmem:[#allocation12 + $0xe0] sm:$0xff]  ;;  %v2755_v12 = vld [vmem:[#allocation12 + $0x98] sm:$0xff] }
 0x34b   : >> { %2310 = vmatpush3.msra.mxu1 %v4158_v5  ;;  %v1605_v27 = vmul.f32 %v1326_v47, %v4101_v41  ;;  %v1608_v41 = vmul.f32 %v4164_v48, %v4122_v36  ;;  %v1607_v53 = vmul.f32 %v4171_v28, %v4130_v62  ;;  %v4727_v36 = vld [vmem:[#allocation63_spill] sm:$0xff]  ;;  %v4730_v5 = vld [vmem:[#allocation66_spill] sm:$0xff] }
 0x34c   : >> { %2311 = vmatprep.subr.mxu1 %v4164_v48  ;;  %v1626_v24 = vadd.f32 %v1622_v6, %v1618_v55  ;;  %v1625_v13 = vadd.f32 %v1621_v57, %v1617_v14  ;;  %v1619_v7 = vmul.f32 %v1324_v60, %v4130_v62  ;;  %v1614_v3 = vsub.f32 %v1606_v38, %v1610_v52  ;;  %v4729_v62 = vld [vmem:[#allocation65_spill] sm:$0xff]  ;;  %v2748_v6 = vld [vmem:[#allocation12 + $0xd0] sm:$0xff]  ;;  %v2750_v57 = vld [vmem:[#allocation12 + $0xc0] sm:$0xff] }
 0x34d   : >> { %2312 = vmatpush3.msra.mxu1 %v4164_v48  ;;  %v1613_v17 = vsub.f32 %v1605_v27, %v1609_v21  ;;  %v1603_v31 = vmul.f32 %v1324_v60, %v4128_v51  ;;  %v1612_v40 = vsub.f32 %v1604_v18, %v1608_v41  ;;  %v4728_v51 = vld [vmem:[#allocation64_spill] sm:$0xff]  ;;  %v2759_v38 = vld [vmem:[#allocation12 + $0x78] sm:$0xff]  ;;  %v2761_v27 = vld [vmem:[#allocation12 + $0x68] sm:$0xff] }
 0x34e   : >> { %2313 = vmatprep.subr.mxu1 %v4171_v28  ;;  %v1623_v61 = vadd.f32 %v1619_v7, %v1615_v32  ;;  %v4732_v48 = vld [vmem:[#allocation68_spill] sm:$0xff]  ;;  %v2763_v21 = vld [vmem:[#allocation12 + $0x58] sm:$0xff] }
 0x34f   : >> { %2314 = vmatpush3.msra.mxu1 %v4171_v28  ;;  %v1611_v22 = vsub.f32 %v1603_v31, %v1607_v53  ;;  %v4736_v28 = vld [vmem:[#allocation72_spill] sm:$0xff]  ;;  %v2766_v31 = vld [vmem:[#allocation12 + $0x40] sm:$0xff]  ;;  %v2769_v53 = vld [vmem:[#allocation12 + $0x28] sm:$0xff] }
 0x350   : >> { %2315 = vmatprep.subr.mxu1 %v1327_v49  ;;  %v2752_v14 = vld [vmem:[#allocation12 + $0xb0] sm:$0xff] }
 0x351   : >> { %2316 = vmatpush3.msra.mxu1 %v1327_v49  ;;  %v2760_v52 = vld [vmem:[#allocation12 + $0x70] sm:$0xff] }
 0x352   : >> { %2317 = vmatprep.subr.mxu1 %v1326_v47  ;;  %v2764_v18 = vld [vmem:[#allocation12 + $0x50] sm:$0xff] }
 0x353   : >> { %2318 = vmatpush3.msra.mxu1 %v1326_v47  ;;  %v2747_v47 = vld [vmem:[#allocation12 + $0xd8] sm:$0xff] }
 0x354   : >> { %2319 = vmatprep.subr.mxu1 %v1325_v46 }
 0x355   : >> { %2320 = vmatpush3.msra.mxu1 %v1325_v46 }
 0x356   : >> { %2321 = vmatprep.subr.mxu1 %v1324_v60 }
 0x357   : >> { %2322 = vmatpush3.msra.mxu1 %v1324_v60  ;;  %v2749_v60 = vld [vmem:[#allocation12 + $0xc8] sm:$0xff] }
 0x358   : >> { %2324 = vmatmul.mubr.msk.f32.vlgmr.msra.gmra.mxu1 %vm1360_vm0, %v1353_v33  ;;  %2335 = vmatprep.subr.mxu1 %v1626_v24 }
 0x359   : >> { %2336 = vmatpush3.msra.mxu1 %v1626_v24  ;;  %2326 = vmatprep.mubr.msk.f32.mxu1 %vm1360_vm0, %v1354_v20 }
 0x35a   : >> { %2337 = vmatprep.subr.mxu1 %v1625_v13 }
 0x35b   : >> { %2338 = vmatpush3.msra.mxu1 %v1625_v13  ;;  %v2754_v13 = vld [vmem:[#allocation12 + $0xa0] sm:$0xff] }
 0x35c   : >> { %2327 = vmatmul.mubr.msk.f32.gmra.mxu1 %vm1360_vm0, %v1355_v2  ;;  %2339 = vmatprep.subr.mxu1 %v1624_v15 }
 0x35d   : >> { %2340 = vmatpush3.msra.mxu1 %v1624_v15  ;;  %2329 = vmatprep.mubr.msk.f32.mxu1 %vm1360_vm0, %v1356_v25  ;;  %v2757_v15 = vld [vmem:[#allocation12 + $0x88] sm:$0xff] }
 0x35e   : >> { %2341 = vmatprep.subr.mxu1 %v1623_v61 }
 0x35f   : >> { %2342 = vmatpush3.msra.mxu1 %v1623_v61 }
 0x360   : >> { %2330 = vmatmul.mubr.msk.f32.gmra.mxu1 %vm1360_vm0, %v1357_v56  ;;  %2343 = vmatprep.subr.mxu1 %v1614_v3 }
 0x361   : >> { %2344 = vmatpush3.msra.mxu1 %v1614_v3  ;;  %2332 = vmatprep.mubr.msk.f32.mxu1 %vm1360_vm0, %v1358_v34  ;;  %v2762_v3 = vld [vmem:[#allocation12 + $0x60] sm:$0xff] }
 0x362   : >> { %2345 = vmatprep.subr.mxu1 %v1613_v17 }
 0x363   : >> { %2346 = vmatpush3.msra.mxu1 %v1613_v17  ;;  %v2765_v17 = vld [vmem:[#allocation12 + $0x48] sm:$0xff] }
 0x364   : >> { %2333 = vmatmul.mubr.msk.f32.gmra.mxu1 %vm1360_vm0, %v1359_v35  ;;  %2347 = vmatprep.subr.mxu1 %v1612_v40 }
 0x365   : >> { %2348 = vmatpush3.msra.mxu1 %v1612_v40  ;;  %2351 = vmatprep.mubr.msk.f32.mxu1 %vm1360_vm0, %v4070_v0  ;;  %v4726_v0 = vld [vmem:[#allocation62_spill] sm:$0xff]  ;;  %v2768_v40 = vld [vmem:[#allocation12 + $0x30] sm:$0xff] }
 0x366   : >> { %2349 = vmatprep.subr.mxu1 %v1611_v22 }
 0x367   : >> { %2350 = vmatpush3.msra.mxu1 %v1611_v22 }
 0x368   : >> { %2352 = vmatmul.mubr.msk.f32.vlgmr.msra.gmra.mxu1 %vm1360_vm0, %v1353_v33  ;;  %2363 = vmatprep.subr.mxu1 %v3801_v58  ;;  %v4715_v58 = vld [vmem:[#allocation52_spill] sm:$0xff]  ;;  %v2751_v33 = vld [vmem:[#allocation12 + $0xb8] sm:$0xff] }
 0x369   : >> { %2354 = vmatprep.mubr.msk.f32.mxu1 %vm1360_vm0, %v1354_v20  ;;  %2379 = vmatpush1.msra.mxu1 %v3803_v43  ;;  %v4716_v43 = vld [vmem:[#allocation53_spill] sm:$0xff]  ;;  %v2753_v20 = vld [vmem:[#allocation12 + $0xa8] sm:$0xff] }
 0x36a   : >> { %2364 = vmatprep.subr.mxu1 %v3805_v59  ;;  %v4717_v59 = vld [vmem:[#allocation54_spill] sm:$0xff] }
 0x36b   : >> { %2380 = vmatpush1.msra.mxu1 %v3808_v26  ;;  %v4718_v26 = vmov 0.0  }
 0x36c   : >> { %2355 = vmatmul.mubr.msk.f32.gmra.mxu1 %vm1360_vm0, %v1355_v2  ;;  %2365 = vmatprep.subr.mxu1 %v3811_v1  ;;  %v4719_v1 = vld [vmem:[#allocation55_spill] sm:$0xff]  ;;  %v2756_v2 = vld [vmem:[#allocation12 + $0x90] sm:$0xff] }
 0x36d   : >> { %2357 = vmatprep.mubr.msk.f32.mxu1 %vm1360_vm0, %v1356_v25  ;;  %2381 = vmatpush1.msra.mxu1 %v3814_v42  ;;  %v4720_v42 = vld [vmem:[#allocation56_spill] sm:$0xff]  ;;  %v2758_v25 = vld [vmem:[#allocation12 + $0x80] sm:$0xff] }
 0x36e   : >> { %2366 = vmatprep.subr.mxu1 %v3817_v44  ;;  %v4721_v44 = vld [vmem:[#allocation57_spill] sm:$0xff] }
 0x36f   : >> { %2382 = vmatpush1.msra.mxu1 %v3820_v10  ;;  %v4722_v10 = vld [vmem:[#allocation58_spill] sm:$0xff] }
 0x370   : >> { %2358 = vmatmul.mubr.msk.f32.gmra.mxu1 %vm1360_vm0, %v1357_v56  ;;  %2367 = vmatprep.subr.mxu1 %v3823_v54  ;;  %v4723_v54 = vld [vmem:[#allocation59_spill] sm:$0xff] }
 0x371   : >> { %2360 = vmatprep.mubr.msk.f32.mxu1 %vm1360_vm0, %v1358_v34  ;;  %2383 = vmatpush1.msra.mxu1 %v3826_v11  ;;  %v4724_v11 = vld [vmem:[#allocation60_spill] sm:$0xff] }
 0x372   : >> { %2368 = vmatprep.subr.mxu1 %v3829_v16  ;;  %v4725_v16 = vld [vmem:[#allocation61_spill] sm:$0xff] }
 0x373   : >> { %2384 = vmatpush1.msra.mxu1 %v4715_v58  ;;  %v2770_v58 = vld [vmem:[#allocation12 + $0x20] sm:$0xff] }
 0x374   : >> { %2361 = vmatmul.mubr.msk.f32.gmra.mxu1 %vm1360_vm0, %v1359_v35  ;;  %2369 = vmatprep.subr.mxu1 %v4716_v43  ;;  %v2767_v35 = vld [vmem:[#allocation12 + $0x38] sm:$0xff] }
 0x375   : >> { %2385 = vmatpush1.msra.mxu1 %v4717_v59  ;;  %1811 = vmatprep.mubr.f32.mxu1 %v4718_v26  ;;  %v2771_v43 = vld [vmem:[#allocation12 + $0x18] sm:$0xff]  ;;  %v2772_v59 = vld [vmem:[#allocation12 + $0x10] sm:$0xff] }
 0x376   : >> { %2370 = vmatprep.subr.mxu1 %v4719_v1  ;;  %v2773_v1 = vld [vmem:[#allocation12 + $0x8] sm:$0xff] }
 0x377   : >> { %2386 = vmatpush1.msra.mxu1 %v4720_v42 }
 0x378   : >> { %2371 = vmatprep.subr.mxu1 %v4721_v44  ;;  %v2774_v44 = vld [vmem:[#allocation12] sm:$0xff] }
 0x379   : >> { %2387 = vmatpush1.msra.mxu1 %v4722_v10 }
 0x37a   : >> { %2372 = vmatprep.subr.mxu1 %v4723_v54 }
 0x37b   : >> { %2388 = vmatpush1.msra.mxu1 %v4724_v11 }
 0x37c   : >> { %2373 = vmatprep.subr.mxu1 %v4725_v16 }
 0x37d   : >> { %2389 = vmatpush1.msra.mxu1 %v4726_v0 }
 0x37e   : >> { %2374 = vmatprep.subr.mxu1 %v4727_v36 }
 0x37f   : >> { %2390 = vmatpush1.msra.mxu1 %v4728_v51 }
 0x380   : >> { %2375 = vmatprep.subr.mxu1 %v4729_v62 }
 0x381   : >> { %2391 = vmatpush1.msra.mxu1 %v4730_v5 }
 0x382   : >> { %2376 = vmatprep.subr.mxu1 %v4731_v8 }
 0x383   : >> { %2392 = vmatpush1.msra.mxu1 %v4732_v48 }
 0x384   : >> { %2377 = vmatprep.subr.mxu1 %v4733_v50 }
 0x385   : >> { %2393 = vmatpush1.msra.mxu1 %v4734_v23 }
 0x386   : >> { %2378 = vmatprep.subr.mxu1 %v4735_v30 }
 0x387   : >> { %2394 = vmatpush1.msra.mxu1 %v4736_v28 }
 0x418   : >> { %v2325_v37 = vpop.f32.mrf.mxu1 }
 0x41a   : >> { %v1451_v29 = vpop.f32.mrf.mxu1 }
 0x41b   : >> { %1555 = vmatmul.mubr.f32.vlgmr.msra.gmra.mxu0 %v1451_v29 }
 0x41c   : >> { %v2328_v39 = vpop.f32.mrf.mxu1  ;;  %1733 = vmatpush1.msra.mxu0 %v2744_v45  ;;  %1559 = vmatprep.mubr.f32.mxu0 %v4718_v26 }
 0x41d   : >> { %1734 = vmatprep.subr.mxu0 %v2745_v19  ;;  %v4739_v19 = vld [vmem:[#allocation40_spill] sm:$0xff] }
 0x41e   : >> { %v1461_v49 = vpop.f32.mrf.mxu1  ;;  %1735 = vmatpush1.msra.mxu0 %v2746_v63 }
 0x41f   : >> { %1560 = vmatmul.mubr.f32.gmra.mxu0 %v2325_v37  ;;  %1736 = vmatprep.subr.mxu0 %v2747_v47 }
 0x420   : >> { %v2331_v46 = vpop.f32.mrf.mxu1  ;;  %1737 = vmatpush1.msra.mxu0 %v2748_v6  ;;  %1564 = vmatprep.mubr.f32.mxu0 %v4718_v26 }
 0x421   : >> { %1738 = vmatprep.subr.mxu0 %v2749_v60  ;;  %v4741_v60 = vld [vmem:[#allocation25_spill] sm:$0xff] }
 0x422   : >> { %v1471_v55 = vpop.f32.mrf.mxu1  ;;  %1739 = vmatpush1.msra.mxu0 %v2750_v57  ;;  %v4742_v57 = vld [vmem:[#allocation80_spill] sm:$0xff] }
 0x423   : >> { %1565 = vmatmul.mubr.f32.gmra.mxu0 %v1461_v49  ;;  %1740 = vmatprep.subr.mxu0 %v2751_v33  ;;  %v4743_v33 = vmax.f32 %v4742_v57, 0.0 }
 0x424   : >> { %v2334_v24 = vpop.f32.mrf.mxu1  ;;  %1741 = vmatpush1.msra.mxu0 %v2752_v14  ;;  %1569 = vmatprep.mubr.f32.mxu0 %v4718_v26 }
 0x425   : >> { %1742 = vmatprep.subr.mxu0 %v2753_v20 }
 0x426   : >> { %v1481_v9 = vpop.f32.mrf.mxu1  ;;  %1743 = vmatpush1.msra.mxu0 %v2754_v13 }
 0x427   : >> { %1570 = vmatmul.mubr.f32.gmra.mxu0 %v2328_v39  ;;  %1744 = vmatprep.subr.mxu0 %v2755_v12 }
 0x428   : >> { %v4257_v7 = vpop.f32.mrf.mxu1  ;;  %1745 = vmatpush1.msra.mxu0 %v2756_v2  ;;  %1574 = vmatprep.mubr.f32.mxu0 %v4718_v26 }
 0x429   : >> { %1746 = vmatprep.subr.mxu0 %v2757_v15 }
 0x42a   : >> { %v1693_v32 = vpop.f32.mrf.mxu1  ;;  %1747 = vmatpush1.msra.mxu0 %v2758_v25 }
 0x42b   : >> { %1575 = vmatmul.mubr.f32.gmra.mxu0 %v1471_v55  ;;  %1748 = vmatprep.subr.mxu0 %v2759_v38 }
 0x42c   : >> { %v2356_v61 = vpop.f32.mrf.mxu1  ;;  %1749 = vmatpush1.msra.mxu0 %v2760_v52  ;;  %1579 = vmatprep.mubr.f32.mxu0 %v4718_v26 }
 0x42d   : >> { %1750 = vmatprep.subr.mxu0 %v2761_v27  ;;  %1812 = vmatmul.mubr.f32.vlgmr.msra.gmra.mxu1 %v2356_v61  ;;  %v4746_v61 = vld [vmem:[#allocation24_spill] sm:$0xff]  ;;  %v4747_v27 = vld [vmem:[#allocation78_spill] sm:$0xff] }
 0x42e   : >> { %v1703_v56 = vpop.f32.mrf.mxu1  ;;  %1751 = vmatpush1.msra.mxu0 %v2762_v3  ;;  %1816 = vmatprep.mubr.f32.mxu1 %v4718_v26 }
 0x42f   : >> { %1580 = vmatmul.mubr.f32.gmra.mxu0 %v2331_v46  ;;  %1752 = vmatprep.subr.mxu0 %v2763_v21 }
 0x430   : >> { %v2359_v34 = vpop.f32.mrf.mxu1  ;;  %1753 = vmatpush1.msra.mxu0 %v2764_v18  ;;  %1584 = vmatprep.mubr.f32.mxu0 %v4718_v26 }
 0x431   : >> { %1754 = vmatprep.subr.mxu0 %v2765_v17  ;;  %v4749_v17 = vld [vmem:[#allocation75_spill] sm:$0xff] }
 0x432   : >> { %v1713_v41 = vpop.f32.mrf.mxu1  ;;  %1755 = vmatpush1.msra.mxu0 %v2766_v31 }
 0x433   : >> { %1585 = vmatmul.mubr.f32.gmra.mxu0 %v1481_v9  ;;  %1756 = vmatprep.subr.mxu0 %v2767_v35 }
 0x434   : >> { %1817 = vmatmul.mubr.f32.gmra.mxu1 %v1713_v41  ;;  %1757 = vmatpush1.msra.mxu0 %v2768_v40  ;;  %v2362_v22 = vpop.f32.mrf.mxu1 }
 0x435   : >> { %1758 = vmatprep.subr.mxu0 %v2769_v53  ;;  %1589 = vmatprep.mubr.f32.mxu0 %v4718_v26 }
 0x436   : >> { %1759 = vmatpush1.msra.mxu0 %v2770_v58  ;;  %1821 = vmatprep.mubr.f32.mxu1 %v4718_v26  ;;  %v1723_v42 = vpop.f32.mrf.mxu1  ;;  %v4750_v58 = vld [vmem:[#allocation39_spill] sm:$0xff] }
 0x437   : >> { %1590 = vmatmul.mubr.f32.gmra.mxu0 %v2334_v24  ;;  %1760 = vmatprep.subr.mxu0 %v2771_v43 }
 0x438   : >> { %1822 = vmatmul.mubr.f32.gmra.mxu1 %v2359_v34  ;;  %1761 = vmatpush1.msra.mxu0 %v2772_v59 }
 0x439   : >> { %1762 = vmatprep.subr.mxu0 %v2773_v1  ;;  %1796 = vmatprep.mubr.f32.mxu0 %v4718_v26 }
 0x43a   : >> { %1763 = vmatpush1.msra.mxu0 %v2774_v44  ;;  %1826 = vmatprep.mubr.f32.mxu1 %v4718_v26 }
 0x43b   : >> { %1797 = vmatmul.mubr.f32.vlgmr.msra.gmra.mxu0 %v1693_v32 }
 0x43c   : >> { %1827 = vmatmul.mubr.f32.gmra.mxu1 %v1723_v42  ;;  %1801 = vmatprep.mubr.f32.mxu0 %v4718_v26  ;;  %v4751_v42 = vld [vmem:[#allocation23_spill] sm:$0xff] }
 0x43d   : >> { %1831 = vmatprep.mubr.f32.mxu1 %v4718_v26 }
 0x43f   : >> { %1802 = vmatmul.mubr.f32.gmra.mxu0 %v4257_v7 }
 0x440   : >> { %1832 = vmatmul.mubr.f32.gmra.mxu1 %v2362_v22  ;;  %1806 = vmatprep.mubr.f32.mxu0 %v4718_v26  ;;  %v4737_v26 = vld [vmem:[#allocation79_spill] sm:$0xff] }
 0x441   : >> { %v4738_v37 = vmax.f32 %v4737_v26, 0.0 }
 0x443   : >> { %1807 = vmatmul.mubr.f32.gmra.mxu0 %v1703_v56  ;;  %v4748_v56 = vmax.f32 %v4747_v27, 0.0 }
 0x4db   : >> { %v1556_v10 = vpop.f32.mrf.mxu0 }
 0x4dd   : >> { %v1558_v54 = vpop.f32.mrf.mxu0 }
 0x4df   : >> { %v1561_v11 = vpop.f32.mrf.mxu0 }
 0x4e1   : >> { %v1563_v16 = vpop.f32.mrf.mxu0 }
 0x4e3   : >> { %v1566_v0 = vpop.f32.mrf.mxu0 }
 0x4e5   : >> { %v1568_v36 = vpop.f32.mrf.mxu0 }
 0x4e6   : >> { %v4755_v36 = vld [vmem:[#allocation76_spill] sm:$0xff] }
 0x4e7   : >> { %v1571_v51 = vpop.f32.mrf.mxu0 }
 0x4e9   : >> { %v1573_v62 = vpop.f32.mrf.mxu0 }
 0x4eb   : >> { %v1576_v5 = vpop.f32.mrf.mxu0 }
 0x4ed   : >> { %v1577_v8 = vpop.f32.mrf.mxu0  ;;  %v4271_v48 = vpop.f32.mrf.mxu1 }
 0x4ee   : >> { %v1595_v50 = vadd.f32 %v1577_v8, %v1556_v10  ;;  %v4752_v10 = vld [vmem:[#allocation77_spill] sm:$0xff] }
 0x4ef   : >> { %v1581_v23 = vpop.f32.mrf.mxu0  ;;  %v1815_v30 = vpop.f32.mrf.mxu1  ;;  %v4753_v54 = vmax.f32 %v4752_v10, 0.0  ;;  %v4770_v10 = vld [vmem:[#allocation35_spill] sm:$0xff] }
 0x4f0   : >> { %v4273_v23 = vmul.f32 0.0009765625, %v1595_v50  }
 0x4f1   : >> { %v1582_v28 = vpop.f32.mrf.mxu0 }
 0x4f2   : >> { %v1913_v29 = vsub.f32 %v4273_v23, %v4738_v37  ;;  %v1596_v39 = vadd.f32 %v1582_v28, %v1561_v11  ;;  %1873 = vrot.lane.b32.xlu0 %v4273_v23, %s3204_s4  ;;  %v1857_v46 = vrot.slane %v4273_v23, 1  ;;  %v4756_v28 = vld [vmem:[#allocation44_spill] sm:$0xff] }
 0x4f3   : >> { %v1586_v45 = vpop.f32.mrf.mxu0 }
 0x4f4   : >> { %v1917_v49 = vmul.f32 %v1913_v29, %v4739_v19  ;;  %v4281_v22 = vmul.f32 0.0009765625, %v1596_v39   ;;  %v1818_v47 = vpop.f32.mrf.mxu1 }
 0x4f5   : >> { %v1587_v6 = vpop.f32.mrf.mxu0 }
 0x4f6   : >> { %v4740_v63 = vmov %v4281_v22  ;;  %v4285_v7 = vadd.f32 %v4741_v60, %v1917_v49   ;;  %v1597_v14 = vadd.f32 %v1587_v6, %v1566_v0  ;;  %v1819_v20 = vpop.f32.mrf.mxu1  ;;  %v4754_v0 = vld [vmem:[#allocation33_spill] sm:$0xff]  ;;  %v4757_v60 = vld [vmem:[#allocation22_spill] sm:$0xff] }
 0x4f7   : >> { %v1858_v55 = vrot.slane %v4740_v63, 1  ;;  %v1914_v24 = vsub.f32 %v4740_v63, %v4743_v33  ;;  %1875 = vrot.lane.b32.xlu1 %v4740_v63, %s3204_s4  ;;  %v1591_v9 = vpop.f32.mrf.mxu0  ;;  %1925 = vst [vmem:[%s3407_s15] sm:$0xff] (%p4387_p8), %v4740_v63 }
 0x4f8   : >> { %v4296_v21 = vmul.f32 0.0009765625, %v1597_v14   ;;  %v1823_v15 = vpop.f32.mrf.mxu1 }
 0x4f9   : >> { %v1863_v12 = vsel %vm521_vm4, %v1857_v46, %v1858_v55  ;;  %v1918_v2 = vmul.f32 %v1914_v24, %v4739_v19  ;;  %v1592_v38 = vpop.f32.mrf.mxu0 }
 0x4fa   : >> { %v4745_v32 = vmov %v4296_v21  ;;  %v1865_v25 = vsub.f32 %v4273_v23, %v1863_v12  ;;  %v1598_v34 = vadd.f32 %v1592_v38, %v1571_v51  ;;  %v1824_v18 = vpop.f32.mrf.mxu1  ;;  %v4761_v12 = vld [vmem:[#allocation37_spill] sm:$0xff] }
 0x4fb   : >> { %v4300_v6 = vadd.f32 %v4746_v61, %v1918_v2   ;;  %v1859_v52 = vrot.slane %v4745_v32, 1  ;;  %v1915_v3 = vsub.f32 %v4745_v32, %v4748_v56  ;;  %1877 = vrot.lane.b32.xlu0 %v4745_v32, %s3204_s4  ;;  %v1798_v41 = vpop.f32.mrf.mxu0  ;;  %v4762_v61 = vld [vmem:[#allocation74_spill] sm:$0xff]  ;;  %1926 = vst [vmem:[%s3407_s15 + $0x8] sm:$0xff] (%p4387_p8), %v4745_v32 }
 0x4fc   : >> { %v1889_v21 = vsub.f32 %v1865_v25, %v4749_v17  ;;  %v4312_v40 = vmul.f32 0.0009765625, %v1598_v34   ;;  %v1837_v53 = vadd.f32 %v1819_v20, %v1798_v41  ;;  %v1828_v22 = vpop.f32.mrf.mxu1  ;;  %v4760_v20 = vld [vmem:[#allocation73_spill] sm:$0xff]  ;;  %v4763_v56 = vld [vmem:[#allocation42_spill] sm:$0xff] }
 0x4fd   : >> { %v1862_v31 = vsel %vm521_vm4, %v1858_v55, %v1859_v52  ;;  %v1919_v35 = vmul.f32 %v1915_v3, %v4739_v19  ;;  %v1800_v1 = vpop.f32.mrf.mxu0  ;;  %v4767_v22 = vld [vmem:[#allocation30_spill] sm:$0xff] }
 0x4fe   : >> { %v1893_v43 = vmul.f32 %v1889_v21, %v4750_v58  ;;  %v1866_v59 = vsub.f32 %v4740_v63, %v1862_v31  ;;  %v1860_v44 = vrot.slane %v4312_v40, 1  ;;  %v1916_v11 = vsub.f32 %v4312_v40, %v4753_v54  ;;  %v1829_v16 = vpop.f32.mrf.mxu1  ;;  %1879 = vrot.lane.b32.xlu1 %v4312_v40, %s3204_s4  ;;  %v4764_v21 = vld [vmem:[#allocation31_spill] sm:$0xff]  ;;  %v4765_v31 = vld [vmem:[#allocation41_spill] sm:$0xff] }
 0x4ff   : >> { %v4317_v5 = vadd.f32 %v4751_v42, %v1919_v35   ;;  %v4323_v3 = vmul.f32 0.0009765625, %v1837_v53   ;;  %v1803_v62 = vpop.f32.mrf.mxu0  ;;  %v4766_v53 = vld [vmem:[#allocation43_spill] sm:$0xff] }
 0x500   : >> { %v4328_v15 = vadd.f32 %v4754_v0, %v1893_v43   ;;  %v1890_v51 = vsub.f32 %v1866_v59, %v4755_v36  ;;  %v1861_v8 = vsel %vm521_vm4, %v1859_v52, %v1860_v44  ;;  %v1864_v50 = vsel %vm521_vm4, %v1860_v44, %v1857_v46  ;;  %v1833_v37 = vpop.f32.mrf.mxu1  ;;  %v4758_v46 = vld [vmem:[#allocation32_spill] sm:$0xff]  ;;  %v4769_v44 = vld [vmem:[#allocation34_spill] sm:$0xff]  ;;  %v4771_v36 = vld [vmem:[#allocation47_spill] sm:$0xff] }
 0x501   : >> { %v1920_v30 = vmul.f32 %v1916_v11, %v4739_v19  ;;  %v1845_v26 = vsub.f32 %v4323_v3, %v4756_v28  ;;  %v1867_v39 = vsub.f32 %v4745_v32, %v1861_v8  ;;  %v1868_v45 = vsub.f32 %v4312_v40, %v1864_v50  ;;  %v1805_v47 = vpop.f32.mrf.mxu0  ;;  %v4759_v19 = vld [vmem:[#allocation46_spill] sm:$0xff]  ;;  %v4768_v43 = vld [vmem:[#allocation36_spill] sm:$0xff]  ;;  %v4772_v8 = vld [vmem:[#allocation51_spill] sm:$0xff] }
 0x502   : >> { %v1894_v29 = vmul.f32 %v1890_v51, %v4750_v58  ;;  %v1838_v49 = vadd.f32 %v1824_v18, %v1803_v62  ;;  %v1834_v33 = vpop.f32.mrf.mxu1 }
 0x503   : >> { %v1924_v55 = vadd.f32 %v4757_v60, %v1920_v30   ;;  %v1849_v57 = vmul.f32 %v1845_v26, %v4714_v4  ;;  %v1872_v24 = vmul.f32 %v4759_v19, %v1868_v45  ;;  %v1891_v9 = vsub.f32 %v1867_v39, %v4760_v20  ;;  %v1808_v13 = vpop.f32.mrf.mxu0 }
 0x504   : >> { %v4344_v14 = vadd.f32 %v4758_v46, %v1894_v29   ;;  %v1842_v2 = vmul.f32 0.0009765625, %v1838_v49   ;;  %v1840_v25 = vadd.f32 %v1834_v33, %v4271_v48  ;;  %v1839_v38 = vadd.f32 %v1829_v16, %v1808_v13  ;;  %v4774_v29 = vld [vmem:[#allocation49_spill] sm:$0xff]  ;;  %v4776_v33 = vld [vmem:[#allocation50_spill] sm:$0xff] }
 0x505   : >> { %v4349_v19 = vadd.f32 %v4761_v12, %v1849_v57   ;;  %v1892_v52 = vsub.f32 %v1872_v24, %v4762_v61  ;;  %v1895_v27 = vmul.f32 %v1891_v9, %v4750_v58  ;;  %v1810_v18 = vpop.f32.mrf.mxu0  ;;  %v4775_v57 = vld [vmem:[#allocation28_spill] sm:$0xff] }
 0x506   : >> { %v1846_v34 = vsub.f32 %v1842_v2, %v4763_v56  ;;  %v1844_v0 = vmul.f32 0.0009765625, %v1840_v25   ;;  %v1843_v1 = vmul.f32 0.0009765625, %v1839_v38   ;;  %v4777_v25 = vld [vmem:[#allocation27_spill] sm:$0xff]  ;;  %v4778_v61 = vld [vmem:[#allocation48_spill] sm:$0xff]  ;;  %v4779_v56 = vld [vmem:[#allocation26_spill] sm:$0xff] }
 0x507   : >> { %v1896_v17 = vmul.f32 %v1892_v52, %v4750_v58  ;;  %v1899_v13 = vadd.f32 %v4764_v21, %v1895_v27   ;;  %v4784_v21 = vmov %v4745_v32 }
 0x508   : >> { %v1850_v41 = vmul.f32 %v1846_v34, %v4714_v4  ;;  %v1848_v35 = vsub.f32 %v1844_v0, %v4765_v31  ;;  %v1847_v48 = vsub.f32 %v1843_v1, %v4766_v53 }
 0x509   : >> { %v1900_v12 = vadd.f32 %v4767_v22, %v1896_v17   ;;  %v4785_v22 = vmov %v4740_v63 }
 0x50a   : >> { %v1854_v18 = vadd.f32 %v4768_v43, %v1850_v41   ;;  %v1852_v59 = vmul.f32 %v1848_v35, %v4714_v4  ;;  %v1851_v42 = vmul.f32 %v1847_v48, %v4714_v4  ;;  %v4773_v4 = vld [vmem:[#allocation29_spill] sm:$0xff] }
 0x50c   : >> { %v1856_v16 = vadd.f32 %v4769_v44, %v1852_v59   ;;  %v1855_v17 = vadd.f32 %v4770_v10, %v1851_v42  }
 0x564   : >> { %v1874_v54 = vpop.permute.xlu0 %1873 }
 0x565   : >> { %v1881_v11 = vsub.f32 %v4273_v23, %v1874_v54 }
 0x567   : >> { %v1885_v51 = vmul.f32 %v4771_v36, %v1881_v11 }
 0x569   : >> { %v1876_v62 = vpop.permute.xlu1 %1875  ;;  %v1901_v50 = vsub.f32 %v1885_v51, %v4772_v8 }
 0x56a   : >> { %v1882_v30 = vsub.f32 %v4740_v63, %v1876_v62 }
 0x56b   : >> { %v1905_v28 = vmul.f32 %v1901_v50, %v4750_v58 }
 0x56c   : >> { %v1886_v26 = vmul.f32 %v4771_v36, %v1882_v30 }
 0x56d   : >> { %v1878_v37 = vpop.permute.xlu0 %1877  ;;  %v1909_v11 = vadd.f32 %v4773_v4, %v1905_v28   ;;  %v4781_v4 = vmov %v1924_v55 }
 0x56e   : >> { %v1902_v39 = vsub.f32 %v1886_v26, %v4774_v29  ;;  %v1883_v45 = vsub.f32 %v4745_v32, %v1878_v37 }
 0x570   : >> { %v1906_v49 = vmul.f32 %v1902_v39, %v4750_v58  ;;  %v1887_v47 = vmul.f32 %v4771_v36, %v1883_v45  ;;  %v1880_v60 = vpop.permute.xlu1 %1879 }
 0x571   : >> { %v1884_v24 = vsub.f32 %v4312_v40, %v1880_v60 }
 0x572   : >> { %v1910_v10 = vadd.f32 %v4775_v57, %v1906_v49   ;;  %v1903_v46 = vsub.f32 %v1887_v47, %v4776_v33 }
 0x573   : >> { %v1888_v9 = vmul.f32 %v4771_v36, %v1884_v24 }
 0x574   : >> { %v1907_v20 = vmul.f32 %v1903_v46, %v4750_v58 }
 0x575   : >> { %v1904_v52 = vsub.f32 %v1888_v9, %v4778_v61  ;;  %420 = sbr.rel (!%p4387_p8) target bundleno = 112 (0x70), region = 124 }
 0x576   : >> { %v1911_v38 = vadd.f32 %v4777_v25, %v1907_v20   ;;  %v4783_v20 = vmov %v4312_v40 }
 0x577   : >> { %v1908_v27 = vmul.f32 %v1904_v52, %v4750_v58 }
 0x578   : >> { %v4782_v9 = vmov %v1911_v38 }
 0x579   : >> { %v1912_v8 = vadd.f32 %v4779_v56, %v1908_v27  }
 0x57a   : > { %2929 = shalt.err (!%p2926_p4)
}
 0x57b   : > { %s2930_s15 = scalar_lea.hbm %s4462_s17, 256  ;;  %s2934_s16 = scalar_lea.hbm %s4518_s9, 512 }
 0x57c   : > { %p2931_p12 = scmp.ne.s32.totalorder %s4462_s17, %s2930_s15  ;;  %p2935_p7 = scmp.lt.s32.totalorder %s4462_s17, %s4518_s9 }
 0x57d   : > { %p2936_p8 = scmp.lt.s32.totalorder %s2934_s16, %s2930_s15 }
 0x57e   : > { %p2932_p10 = pnand %p2931_p12, %p3298_p5 }
 0x57f   : > { %p2937_p11 = por %p2936_p8, %p2935_p7 }
 0x580   : > { %p2933_p9 = pneg %p2932_p10 }
 0x582   : > { %p2938_p1 = pnand %p2937_p11, %p2933_p9 }
 0x584   : > { %2941 = shalt.err (!%p2938_p1)
}
 0x585   : > { %s3208_s4 = smov 128   ;;  %s3209_s21 = smov 8  }
 0x586   : > { %2427 = dma.vmem_to_hbm [thread:$0]  (%p3298_p5), %s4465_s11, 256, %s4462_s17, %s4469_s18, %s3208_s4, %s3208_s4, %s3209_s21  }
 0x587 PF: > { %p2464_p0 = scmp.ge.s32.totalorder %s3092_s12, 2  ;;  %s1956_s24 = sand.u32 1, %s3080_s30  }
 0x588   : > { %s1957_s27 = scalar_lea.sflag [#allocation4], %s1956_s24 }
 0x589   : > { %p2449_p13 = pnand %p2464_p0, %p3302_p6 }
 0x58b   : > { %p2450_p3 = pneg %p2449_p13 }
 0x58d   : > { %3075 = dma.done.wait (%p2450_p3), %s1957_s27, 256  }
 0x58e   : > { %3077 = vsyncadd (%p2450_p3), %s1957_s27, 4294967040  ;;  %s4787_s12 = sld [smem:[#allocation20_spill]]  ;;  %s4790_s30 = smov %s3084_s10 }
 0x58f   : > { %s4788_s28 = sld [smem:[#allocation19_spill]] }
 0x590   : > { %s4789_s11 = sld [smem:[#allocation21_spill]] }
 0x594   : > { %p23_p2 = scmp.ge.s32.totalorder %s4787_s12, 4  }
 0x595   : > { %s4791_s10 = smov %s4788_s28 }
 0x596   :  { %25 = sbr.rel (!%p23_p2) target bundleno = 10 (0xa), region = 135 }
 0x59b   :  { %1962 = vsyncpa [#allocation3], 1 }
 0x59c   :  { %1964 = vsyncpa [#allocation3 + $0x1], 1 }
 0x59d   :  { %1965 = vsyncpa [#allocation8], 1 }
 0x59e   :  { %1966 = vsyncpa [#allocation11], 1 }
 0x59f   :  { %1967 = vsyncpa [#allocation4], 1 }
 0x5a0   :  { %1969 = vsyncpa [#allocation4 + $0x1], 1 }
 0x5a1   :  { %1970 = vsyncpa [#allocation5], 1 }
 0x5a2   :  { %1972 = vsyncpa [#allocation5 + $0x1], 1 }

</bundles_post_ra>
